<compile_context>
chip_gen: v7x
topology: tpu7x:2x2x1
jax: 0.10.0
libtpu: 0.0.40
codegen_flags: <defaults>
</compile_context>

<pallas_src>
import jax
import jax.numpy as jnp
from jax.experimental import pallas as pl
from jax.experimental.pallas import tpu as pltpu


# --------------------------------------------------------------------------
# Kernel
# --------------------------------------------------------------------------
def vae_forward_kernel(
    x_ref, eps_ref, eps2_ref,
    wxh_ref, bxh_ref,
    whz_ref, bhz_ref,       # fused mu|var head: (h_dim, 2*Z_dim), (1, 2*Z_dim)
    wzh_ref, bzh_ref,
    whx_ref, bhx_ref,       # fused mu|var head: (h_dim, 2*X_dim), (1, 2*X_dim)
    z_mu_ref, z_var_ref, z_ref, x_mu_ref, x_var_ref, x_sample_ref,
):
    Z = z_mu_ref.shape[-1]
    Xd = x_mu_ref.shape[-1]

    # bf16 operands for the MXU; f32 accumulation + f32 elementwise throughout.
    x_bf = x_ref[...].astype(jnp.bfloat16)

    # ---- Q(X) ----
    h = jnp.maximum(
        jnp.dot(x_bf, wxh_ref[...], preferred_element_type=jnp.float32)
        + bxh_ref[...],
        0.0,
    )
    # fused z_mu | z_var head -> (TILE_B, 2*Z), split on a 128-lane boundary
    zz = (
        jnp.dot(h.astype(jnp.bfloat16), whz_ref[...],
                preferred_element_type=jnp.float32)
        + bhz_ref[...]
    )
    z_mu = zz[:, :Z]
    z_var = zz[:, Z:]

    # ---- reparameterize (f32) ----
    z = z_mu + jnp.exp(z_var * 0.5) * eps_ref[...]

    # ---- P(z) ----
    h2 = jnp.maximum(
        jnp.dot(z.astype(jnp.bfloat16), wzh_ref[...],
                preferred_element_type=jnp.float32)
        + bzh_ref[...],
        0.0,
    )
    # fused x_mu | x_var head -> (TILE_B, 2*X); ReLU is elementwise so it can
    # be applied to the fused block before splitting.
    xx = jnp.maximum(
        jnp.dot(h2.astype(jnp.bfloat16), whx_ref[...],
                preferred_element_type=jnp.float32)
        + bhx_ref[...],
        0.0,
    )
    x_mu = xx[:, :Xd]
    x_var = xx[:, Xd:]
    x_sample = x_mu + jnp.exp(x_var * 0.5) * eps2_ref[...]

    # z-side outputs stay f32; x-side outputs cast to the (bf16) out dtype.
    z_mu_ref[...] = z_mu
    z_var_ref[...] = z_var
    z_ref[...] = z
    x_mu_ref[...] = x_mu.astype(x_mu_ref.dtype)
    x_var_ref[...] = x_var.astype(x_var_ref.dtype)
    x_sample_ref[...] = x_sample.astype(x_sample_ref.dtype)


# --------------------------------------------------------------------------
# One-time parameter prep (hoisted out of the forward pass)
# --------------------------------------------------------------------------
def fuse_params(params):
    """Fuse mu|var heads and cast weights to bf16. Call ONCE per parameter
    set; do not re-run per forward call."""
    return {
        "wxh": params["Wxh"].astype(jnp.bfloat16),
        "bxh": params["bxh"],
        "whz": jnp.concatenate(
            [params["Whz_mu"], params["Whz_var"]], axis=1).astype(jnp.bfloat16),
        "bhz": jnp.concatenate([params["bhz_mu"], params["bhz_var"]], axis=1),
        "wzh": params["Wzh"].astype(jnp.bfloat16),
        "bzh": params["bzh"],
        "whx": jnp.concatenate(
            [params["Whx_mu"], params["Whx_var"]], axis=1).astype(jnp.bfloat16),
        "bhx": jnp.concatenate([params["bhx_mu"], params["bhx_var"]], axis=1),
    }


def _choose_tile_b(B, max_tile=1024):
    """Pick a batch tile: big (amortize ~0.35us/step grid overhead) but with
    an EVEN number of grid steps when B allows it, so v7x's two TensorCores
    both get work. Tile rows kept a multiple of 8 (sublane)."""
    if B <= max_tile:
        half = B // 2
        if B % 2 == 0 and half >= 8 and half % 8 == 0:
            return half              # grid=(2,): one step per v7x core
        return B                      # tiny batch: single step
    # Large batch: biggest divisor <= max_tile, multiple of 8, even step count.
    for t in range(max_tile - (max_tile % 8), 7, -8):
        if B % t == 0 and (B // t) % 2 == 0:
            return t
    for t in range(max_tile - (max_tile % 8), 7, -8):
        if B % t == 0:
            return t
    return B


# --------------------------------------------------------------------------
# Wrapper
# --------------------------------------------------------------------------
def simple_nn_forward(X, eps, eps2, fused, *, tile_b=None,
                      x_out_dtype=jnp.bfloat16):
    """fused: output of fuse_params(). Returns
    (z_mu, z_var, z, x_mu, x_var, x_sample)."""
    B, X_dim = X.shape
    h_dim = fused["wxh"].shape[1]
    Z_dim = fused["whz"].shape[1] // 2

    if tile_b is None:
        tile_b = _choose_tile_b(B)
    tile_b = min(tile_b, B)
    assert B % tile_b == 0, "batch must be divisible by the batch tile"
    assert tile_b % 8 == 0 or tile_b == B, "batch tile must be sublane-aligned"
    assert X_dim % 128 == 0 and Z_dim % 128 == 0 and h_dim % 128 == 0, (
        "feature dims must be multiples of 128 so fused-head splits land on "
        "lane boundaries"
    )

    inputs = (X, eps, eps2,
              fused["wxh"], fused["bxh"], fused["whz"], fused["bhz"],
              fused["wzh"], fused["bzh"], fused["whx"], fused["bhx"])

    grid = (B // tile_b,)

    def batch_spec(ncols):
        return pl.BlockSpec((tile_b, ncols), lambda i: (i, 0))

    def resident_spec(arr):
        # full-extent block, constant index_map -> fetched once, VMEM-resident
        return pl.BlockSpec(arr.shape, lambda i: (0, 0))

    in_specs = [
        batch_spec(X_dim),        # X
        batch_spec(Z_dim),        # eps
        batch_spec(X_dim),        # eps2
        resident_spec(fused["wxh"]), resident_spec(fused["bxh"]),
        resident_spec(fused["whz"]), resident_spec(fused["bhz"]),
        resident_spec(fused["wzh"]), resident_spec(fused["bzh"]),
        resident_spec(fused["whx"]), resident_spec(fused["bhx"]),
    ]

    out_shapes = (
        jax.ShapeDtypeStruct((B, Z_dim), jnp.float32),   # z_mu   (KL path: f32)
        jax.ShapeDtypeStruct((B, Z_dim), jnp.float32),   # z_var  (KL path: f32)
        jax.ShapeDtypeStruct((B, Z_dim), jnp.float32),   # z
        jax.ShapeDtypeStruct((B, X_dim), x_out_dtype),   # X_sample_mu
        jax.ShapeDtypeStruct((B, X_dim), x_out_dtype),   # X_sample_var
        jax.ShapeDtypeStruct((B, X_dim), x_out_dtype),   # X_sample
    )
    out_specs = [
        batch_spec(Z_dim), batch_spec(Z_dim), batch_spec(Z_dim),
        batch_spec(X_dim), batch_spec(X_dim), batch_spec(X_dim),
    ]

    # Advisory cost estimate: tiny, DMA-bound custom call -> let XLA overlap it.
    matmul_terms = (X_dim * h_dim + h_dim * 2 * Z_dim
                    + Z_dim * h_dim + h_dim * 2 * X_dim)
    flops = 2 * B * matmul_terms
    transcendentals = B * (Z_dim + X_dim)
    x_bytes = jnp.dtype(x_out_dtype).itemsize
    bytes_accessed = (
        4 * B * (2 * X_dim + Z_dim)            # f32 inputs X, eps, eps2
        + 2 * matmul_terms                     # bf16 weights
        + 4 * (2 * h_dim + 2 * Z_dim + 2 * X_dim)  # f32 biases
        + 3 * B * Z_dim * 4                    # f32 z-side outputs
        + 3 * B * X_dim * x_bytes              # x-side outputs
    )
    cost = pl.CostEstimate(flops=flops, transcendentals=transcendentals,
                           bytes_accessed=bytes_accessed)

    return pl.pallas_call(
        vae_forward_kernel,
        out_shape=out_shapes,
        grid=grid,
        in_specs=in_specs,
        out_specs=out_specs,
        compiler_params=pltpu.CompilerParams(
            dimension_semantics=("parallel",),
        ),
        cost_estimate=cost,
    )(*inputs)


# --------------------------------------------------------------------------
# Init / reference
# --------------------------------------------------------------------------
def xavier_init(key, size):
    # matches torch xavier_init: randn(*size) * 1/sqrt(in_dim/2)
    in_dim = size[0]
    stddev = 1.0 / jnp.sqrt(in_dim / 2.0)
    return jax.random.normal(key, size, dtype=jnp.float32) * stddev


def make_params(key, X_dim, h_dim, Z_dim):
    keys = jax.random.split(key, 6)
    return {
        "Wxh": xavier_init(keys[0], (X_dim, h_dim)),
        "bxh": jnp.zeros((1, h_dim), jnp.float32),
        "Whz_mu": xavier_init(keys[1], (h_dim, Z_dim)),
        "bhz_mu": jnp.zeros((1, Z_dim), jnp.float32),
        "Whz_var": xavier_init(keys[2], (h_dim, Z_dim)),
        "bhz_var": jnp.zeros((1, Z_dim), jnp.float32),
        "Wzh": xavier_init(keys[3], (Z_dim, h_dim)),
        "bzh": jnp.zeros((1, h_dim), jnp.float32),
        "Whx_mu": xavier_init(keys[4], (h_dim, X_dim)),
        "bhx_mu": jnp.zeros((1, X_dim), jnp.float32),
        "Whx_var": xavier_init(keys[5], (h_dim, X_dim)),
        "bhx_var": jnp.zeros((1, X_dim), jnp.float32),
    }


def reference_forward(X, eps, eps2, p, x_out_dtype=jnp.bfloat16):
    """Same math as the PyTorch module with the kernel's numerics
    (bf16 matmul operands, f32 accumulate, f32 elementwise, x-side outputs
    cast to x_out_dtype at the very end)."""
    bf = lambda a: a.astype(jnp.bfloat16)
    dot = lambda a, b: jnp.dot(bf(a), bf(b), preferred_element_type=jnp.float32)

    h = jnp.maximum(dot(X, p["Wxh"]) + p["bxh"], 0.0)
    z_mu = dot(h, p["Whz_mu"]) + p["bhz_mu"]
    z_var = dot(h, p["Whz_var"]) + p["bhz_var"]
    z = z_mu + jnp.exp(z_var / 2.0) * eps
    h2 = jnp.maximum(dot(z, p["Wzh"]) + p["bzh"], 0.0)
    x_mu = jnp.maximum(dot(h2, p["Whx_mu"]) + p["bhx_mu"], 0.0)
    x_var = jnp.maximum(dot(h2, p["Whx_var"]) + p["bhx_var"], 0.0)
    x_sample = x_mu + jnp.exp(x_var / 2.0) * eps2
    return (z_mu, z_var, z,
            x_mu.astype(x_out_dtype), x_var.astype(x_out_dtype),
            x_sample.astype(x_out_dtype))


if __name__ == "__main__":
    # Small, TPU-friendly shapes consistent with the module (all multiples of
    # 128 so fused-head splits land on lane boundaries).
    B, X_dim, h_dim, Z_dim = 256, 256, 128, 128

    key = jax.random.PRNGKey(0)
    k_param, k_x, k_eps, k_eps2 = jax.random.split(key, 4)

    params = make_params(k_param, X_dim, h_dim, Z_dim)
    X = jax.random.uniform(k_x, (B, X_dim), dtype=jnp.float32)       # MNIST-like [0,1) pixels
    eps = jax.random.normal(k_eps, (B, Z_dim), dtype=jnp.float32)    # torch.randn(mb_size, Z_dim)
    eps2 = jax.random.normal(k_eps2, (B, X_dim), dtype=jnp.float32)  # torch.randn(mb_size, X_dim)

    # One-time parameter prep (fusion + bf16 cast), hoisted out of the forward.
    fused = jax.tree_util.tree_map(jnp.asarray, fuse_params(params))

    fwd = jax.jit(simple_nn_forward, static_argnames=("tile_b", "x_out_dtype"))
    outs = fwd(X, eps, eps2, fused)   # tile_b auto-chosen: 128 -> grid=(2,)
    outs = jax.block_until_ready(outs)

    refs = reference_forward(X, eps, eps2, params)
    tols = [(1e-4, 1e-4)] * 3 + [(2e-2, 2e-2)] * 3   # f32 z-side, bf16 x-side
    for o, r, (rtol, atol) in zip(outs, refs, tols):
        assert o.shape == r.shape and o.dtype == r.dtype, (o.shape, o.dtype)
        assert jnp.allclose(o.astype(jnp.float32), r.astype(jnp.float32),
                            rtol=rtol, atol=atol), "mismatch vs reference"

    print("KERNEL_OK")
</pallas_src>

<mosaic_0001>
module attributes {stable_mosaic.version = 11 : i64} {
  func.func @vae_forward_kernel(%arg0: i32, %arg1: memref<128x256xf32, #tpu.memory_space<vmem>>, %arg2: memref<128x128xf32, #tpu.memory_space<vmem>>, %arg3: memref<128x256xf32, #tpu.memory_space<vmem>>, %arg4: memref<256x128xbf16, #tpu.memory_space<vmem>>, %arg5: memref<1x128xf32, #tpu.memory_space<vmem>>, %arg6: memref<128x256xbf16, #tpu.memory_space<vmem>>, %arg7: memref<1x256xf32, #tpu.memory_space<vmem>>, %arg8: memref<128x128xbf16, #tpu.memory_space<vmem>>, %arg9: memref<1x128xf32, #tpu.memory_space<vmem>>, %arg10: memref<128x512xbf16, #tpu.memory_space<vmem>>, %arg11: memref<1x512xf32, #tpu.memory_space<vmem>>, %arg12: memref<128x128xf32, #tpu.memory_space<vmem>>, %arg13: memref<128x128xf32, #tpu.memory_space<vmem>>, %arg14: memref<128x128xf32, #tpu.memory_space<vmem>>, %arg15: memref<128x256xbf16, #tpu.memory_space<vmem>>, %arg16: memref<128x256xbf16, #tpu.memory_space<vmem>>, %arg17: memref<128x256xbf16, #tpu.memory_space<vmem>>) attributes {dimension_semantics = [#tpu.dimension_semantics<parallel>], iteration_bounds = array<i64: 2>, scalar_prefetch = 0 : i64, scratch_operands = 0 : i64, tpu.core_type = #tpu.core_type<tc>, window_params = [{transform_indices = @transform_0, window_bounds = array<i64: 128, 256>}, {transform_indices = @transform_1, window_bounds = array<i64: 128, 128>}, {transform_indices = @transform_2, window_bounds = array<i64: 128, 256>}, {pipeline_mode = #tpu.pipeline_mode<synchronous>, transform_indices = @transform_3, window_bounds = array<i64: 256, 128>}, {pipeline_mode = #tpu.pipeline_mode<synchronous>, transform_indices = @transform_4, window_bounds = array<i64: 1, 128>}, {pipeline_mode = #tpu.pipeline_mode<synchronous>, transform_indices = @transform_5, window_bounds = array<i64: 128, 256>}, {pipeline_mode = #tpu.pipeline_mode<synchronous>, transform_indices = @transform_6, window_bounds = array<i64: 1, 256>}, {pipeline_mode = #tpu.pipeline_mode<synchronous>, transform_indices = @transform_7, window_bounds = array<i64: 128, 128>}, {pipeline_mode = #tpu.pipeline_mode<synchronous>, transform_indices = @transform_8, window_bounds = array<i64: 1, 128>}, {pipeline_mode = #tpu.pipeline_mode<synchronous>, transform_indices = @transform_9, window_bounds = array<i64: 128, 512>}, {pipeline_mode = #tpu.pipeline_mode<synchronous>, transform_indices = @transform_10, window_bounds = array<i64: 1, 512>}, {transform_indices = @transform_11, window_bounds = array<i64: 128, 128>}, {transform_indices = @transform_12, window_bounds = array<i64: 128, 128>}, {transform_indices = @transform_13, window_bounds = array<i64: 128, 128>}, {transform_indices = @transform_14, window_bounds = array<i64: 128, 256>}, {transform_indices = @transform_15, window_bounds = array<i64: 128, 256>}, {transform_indices = @transform_16, window_bounds = array<i64: 128, 256>}]} {
    %c0 = arith.constant 0 : index
    %c0_0 = arith.constant 0 : index
    %0 = vector.load %arg1[%c0, %c0_0] : memref<128x256xf32, #tpu.memory_space<vmem>>, vector<128x256xf32>
    %1 = arith.truncf %0 : vector<128x256xf32> to vector<128x256xbf16>
    %c0_1 = arith.constant 0 : index
    %c0_2 = arith.constant 0 : index
    %2 = vector.load %arg4[%c0_1, %c0_2] : memref<256x128xbf16, #tpu.memory_space<vmem>>, vector<256x128xbf16>
    %cst = arith.constant dense<0.000000e+00> : vector<128x128xf32>
    %3 = tpu.matmul %1, %2, %cst {dimension_numbers = #tpu.dot_dimension_numbers<[1], [0], [0], [1], [0, 0, 1, 1], [], []>} : vector<128x256xbf16>, vector<256x128xbf16>, vector<128x128xf32> -> vector<128x128xf32>
    %c0_3 = arith.constant 0 : index
    %c0_4 = arith.constant 0 : index
    %4 = vector.load %arg5[%c0_3, %c0_4] : memref<1x128xf32, #tpu.memory_space<vmem>>, vector<1x128xf32>
    %5 = vector.broadcast %4 : vector<1x128xf32> to vector<128x128xf32>
    %6 = arith.addf %3, %5 : vector<128x128xf32>
    %cst_5 = arith.constant 0.000000e+00 : f32
    %7 = vector.broadcast %cst_5 : f32 to vector<128x128xf32>
    %8 = arith.maximumf %6, %7 : vector<128x128xf32>
    %9 = arith.truncf %8 : vector<128x128xf32> to vector<128x128xbf16>
    %c0_6 = arith.constant 0 : index
    %c0_7 = arith.constant 0 : index
    %10 = vector.load %arg6[%c0_6, %c0_7] : memref<128x256xbf16, #tpu.memory_space<vmem>>, vector<128x256xbf16>
    %cst_8 = arith.constant dense<0.000000e+00> : vector<128x256xf32>
    %11 = tpu.matmul %9, %10, %cst_8 {dimension_numbers = #tpu.dot_dimension_numbers<[1], [0], [0], [1], [0, 0, 1, 1], [], []>} : vector<128x128xbf16>, vector<128x256xbf16>, vector<128x256xf32> -> vector<128x256xf32>
    %c0_9 = arith.constant 0 : index
    %c0_10 = arith.constant 0 : index
    %12 = vector.load %arg7[%c0_9, %c0_10] : memref<1x256xf32, #tpu.memory_space<vmem>>, vector<1x256xf32>
    %13 = vector.broadcast %12 : vector<1x256xf32> to vector<128x256xf32>
    %14 = arith.addf %11, %13 : vector<128x256xf32>
    %15 = vector.extract_strided_slice %14 {offsets = [0, 0], sizes = [128, 128], strides = [1, 1]} : vector<128x256xf32> to vector<128x128xf32>
    %16 = vector.extract_strided_slice %14 {offsets = [0, 128], sizes = [128, 128], strides = [1, 1]} : vector<128x256xf32> to vector<128x128xf32>
    %cst_11 = arith.constant 5.000000e-01 : f32
    %17 = vector.broadcast %cst_11 : f32 to vector<128x128xf32>
    %18 = arith.mulf %16, %17 : vector<128x128xf32>
    %19 = math.exp %18 : vector<128x128xf32>
    %c0_12 = arith.constant 0 : index
    %c0_13 = arith.constant 0 : index
    %20 = vector.load %arg2[%c0_12, %c0_13] : memref<128x128xf32, #tpu.memory_space<vmem>>, vector<128x128xf32>
    %21 = arith.mulf %19, %20 : vector<128x128xf32>
    %22 = arith.addf %15, %21 : vector<128x128xf32>
    %23 = arith.truncf %22 : vector<128x128xf32> to vector<128x128xbf16>
    %c0_14 = arith.constant 0 : index
    %c0_15 = arith.constant 0 : index
    %24 = vector.load %arg8[%c0_14, %c0_15] : memref<128x128xbf16, #tpu.memory_space<vmem>>, vector<128x128xbf16>
    %cst_16 = arith.constant dense<0.000000e+00> : vector<128x128xf32>
    %25 = tpu.matmul %23, %24, %cst_16 {dimension_numbers = #tpu.dot_dimension_numbers<[1], [0], [0], [1], [0, 0, 1, 1], [], []>} : vector<128x128xbf16>, vector<128x128xbf16>, vector<128x128xf32> -> vector<128x128xf32>
    %c0_17 = arith.constant 0 : index
    %c0_18 = arith.constant 0 : index
    %26 = vector.load %arg9[%c0_17, %c0_18] : memref<1x128xf32, #tpu.memory_space<vmem>>, vector<1x128xf32>
    %27 = vector.broadcast %26 : vector<1x128xf32> to vector<128x128xf32>
    %28 = arith.addf %25, %27 : vector<128x128xf32>
    %cst_19 = arith.constant 0.000000e+00 : f32
    %29 = vector.broadcast %cst_19 : f32 to vector<128x128xf32>
    %30 = arith.maximumf %28, %29 : vector<128x128xf32>
    %31 = arith.truncf %30 : vector<128x128xf32> to vector<128x128xbf16>
    %c0_20 = arith.constant 0 : index
    %c0_21 = arith.constant 0 : index
    %32 = vector.load %arg10[%c0_20, %c0_21] : memref<128x512xbf16, #tpu.memory_space<vmem>>, vector<128x512xbf16>
    %cst_22 = arith.constant dense<0.000000e+00> : vector<128x512xf32>
    %33 = tpu.matmul %31, %32, %cst_22 {dimension_numbers = #tpu.dot_dimension_numbers<[1], [0], [0], [1], [0, 0, 1, 1], [], []>} : vector<128x128xbf16>, vector<128x512xbf16>, vector<128x512xf32> -> vector<128x512xf32>
    %c0_23 = arith.constant 0 : index
    %c0_24 = arith.constant 0 : index
    %34 = vector.load %arg11[%c0_23, %c0_24] : memref<1x512xf32, #tpu.memory_space<vmem>>, vector<1x512xf32>
    %35 = vector.broadcast %34 : vector<1x512xf32> to vector<128x512xf32>
    %36 = arith.addf %33, %35 : vector<128x512xf32>
    %cst_25 = arith.constant 0.000000e+00 : f32
    %37 = vector.broadcast %cst_25 : f32 to vector<128x512xf32>
    %38 = arith.maximumf %36, %37 : vector<128x512xf32>
    %39 = vector.extract_strided_slice %38 {offsets = [0, 0], sizes = [128, 256], strides = [1, 1]} : vector<128x512xf32> to vector<128x256xf32>
    %40 = vector.extract_strided_slice %38 {offsets = [0, 256], sizes = [128, 256], strides = [1, 1]} : vector<128x512xf32> to vector<128x256xf32>
    %cst_26 = arith.constant 5.000000e-01 : f32
    %41 = vector.broadcast %cst_26 : f32 to vector<128x256xf32>
    %42 = arith.mulf %40, %41 : vector<128x256xf32>
    %43 = math.exp %42 : vector<128x256xf32>
    %c0_27 = arith.constant 0 : index
    %c0_28 = arith.constant 0 : index
    %44 = vector.load %arg3[%c0_27, %c0_28] : memref<128x256xf32, #tpu.memory_space<vmem>>, vector<128x256xf32>
    %45 = arith.mulf %43, %44 : vector<128x256xf32>
    %46 = arith.addf %39, %45 : vector<128x256xf32>
    %c0_29 = arith.constant 0 : index
    %c0_30 = arith.constant 0 : index
    %47 = vector.load %arg12[%c0_29, %c0_30] : memref<128x128xf32, #tpu.memory_space<vmem>>, vector<128x128xf32>
    tpu.vector_store %arg12[%c0_29, %c0_30], %15 {strides = array<i32>} : memref<128x128xf32, #tpu.memory_space<vmem>>, vector<128x128xf32>,
    %c0_31 = arith.constant 0 : index
    %c0_32 = arith.constant 0 : index
    %48 = vector.load %arg13[%c0_31, %c0_32] : memref<128x128xf32, #tpu.memory_space<vmem>>, vector<128x128xf32>
    tpu.vector_store %arg13[%c0_31, %c0_32], %16 {strides = array<i32>} : memref<128x128xf32, #tpu.memory_space<vmem>>, vector<128x128xf32>,
    %c0_33 = arith.constant 0 : index
    %c0_34 = arith.constant 0 : index
    %49 = vector.load %arg14[%c0_33, %c0_34] : memref<128x128xf32, #tpu.memory_space<vmem>>, vector<128x128xf32>
    tpu.vector_store %arg14[%c0_33, %c0_34], %22 {strides = array<i32>} : memref<128x128xf32, #tpu.memory_space<vmem>>, vector<128x128xf32>,
    %50 = arith.truncf %39 : vector<128x256xf32> to vector<128x256xbf16>
    %c0_35 = arith.constant 0 : index
    %c0_36 = arith.constant 0 : index
    %51 = vector.load %arg15[%c0_35, %c0_36] : memref<128x256xbf16, #tpu.memory_space<vmem>>, vector<128x256xbf16>
    tpu.vector_store %arg15[%c0_35, %c0_36], %50 {strides = array<i32>} : memref<128x256xbf16, #tpu.memory_space<vmem>>, vector<128x256xbf16>,
    %52 = arith.truncf %40 : vector<128x256xf32> to vector<128x256xbf16>
    %c0_37 = arith.constant 0 : index
    %c0_38 = arith.constant 0 : index
    %53 = vector.load %arg16[%c0_37, %c0_38] : memref<128x256xbf16, #tpu.memory_space<vmem>>, vector<128x256xbf16>
    tpu.vector_store %arg16[%c0_37, %c0_38], %52 {strides = array<i32>} : memref<128x256xbf16, #tpu.memory_space<vmem>>, vector<128x256xbf16>,
    %54 = arith.truncf %46 : vector<128x256xf32> to vector<128x256xbf16>
    %c0_39 = arith.constant 0 : index
    %c0_40 = arith.constant 0 : index
    %55 = vector.load %arg17[%c0_39, %c0_40] : memref<128x256xbf16, #tpu.memory_space<vmem>>, vector<128x256xbf16>
    tpu.vector_store %arg17[%c0_39, %c0_40], %54 {strides = array<i32>} : memref<128x256xbf16, #tpu.memory_space<vmem>>, vector<128x256xbf16>,
    return
  }
  func.func @transform_0(%arg0: i32) -> (i32, i32) {
    %c0_i32 = arith.constant 0 : i32
    %c0_i32_0 = arith.constant 0 : i32
    return %arg0, %c0_i32 : i32, i32
  }
  func.func @transform_1(%arg0: i32) -> (i32, i32) {
    %c0_i32 = arith.constant 0 : i32
    %c0_i32_0 = arith.constant 0 : i32
    return %arg0, %c0_i32 : i32, i32
  }
  func.func @transform_2(%arg0: i32) -> (i32, i32) {
    %c0_i32 = arith.constant 0 : i32
    %c0_i32_0 = arith.constant 0 : i32
    return %arg0, %c0_i32 : i32, i32
  }
  func.func @transform_3(%arg0: i32) -> (i32, i32) {
    %c0_i32 = arith.constant 0 : i32
    %c0_i32_0 = arith.constant 0 : i32
    %c0_i32_1 = arith.constant 0 : i32
    return %c0_i32, %c0_i32_0 : i32, i32
  }
  func.func @transform_4(%arg0: i32) -> (i32, i32) {
    %c0_i32 = arith.constant 0 : i32
    %c0_i32_0 = arith.constant 0 : i32
    %c0_i32_1 = arith.constant 0 : i32
    return %c0_i32, %c0_i32_0 : i32, i32
  }
  func.func @transform_5(%arg0: i32) -> (i32, i32) {
    %c0_i32 = arith.constant 0 : i32
    %c0_i32_0 = arith.constant 0 : i32
    %c0_i32_1 = arith.constant 0 : i32
    return %c0_i32, %c0_i32_0 : i32, i32
  }
  func.func @transform_6(%arg0: i32) -> (i32, i32) {
    %c0_i32 = arith.constant 0 : i32
    %c0_i32_0 = arith.constant 0 : i32
    %c0_i32_1 = arith.constant 0 : i32
    return %c0_i32, %c0_i32_0 : i32, i32
  }
  func.func @transform_7(%arg0: i32) -> (i32, i32) {
    %c0_i32 = arith.constant 0 : i32
    %c0_i32_0 = arith.constant 0 : i32
    %c0_i32_1 = arith.constant 0 : i32
    return %c0_i32, %c0_i32_0 : i32, i32
  }
  func.func @transform_8(%arg0: i32) -> (i32, i32) {
    %c0_i32 = arith.constant 0 : i32
    %c0_i32_0 = arith.constant 0 : i32
    %c0_i32_1 = arith.constant 0 : i32
    return %c0_i32, %c0_i32_0 : i32, i32
  }
  func.func @transform_9(%arg0: i32) -> (i32, i32) {
    %c0_i32 = arith.constant 0 : i32
    %c0_i32_0 = arith.constant 0 : i32
    %c0_i32_1 = arith.constant 0 : i32
    return %c0_i32, %c0_i32_0 : i32, i32
  }
  func.func @transform_10(%arg0: i32) -> (i32, i32) {
    %c0_i32 = arith.constant 0 : i32
    %c0_i32_0 = arith.constant 0 : i32
    %c0_i32_1 = arith.constant 0 : i32
    return %c0_i32, %c0_i32_0 : i32, i32
  }
  func.func @transform_11(%arg0: i32) -> (i32, i32) {
    %c0_i32 = arith.constant 0 : i32
    %c0_i32_0 = arith.constant 0 : i32
    return %arg0, %c0_i32 : i32, i32
  }
  func.func @transform_12(%arg0: i32) -> (i32, i32) {
    %c0_i32 = arith.constant 0 : i32
    %c0_i32_0 = arith.constant 0 : i32
    return %arg0, %c0_i32 : i32, i32
  }
  func.func @transform_13(%arg0: i32) -> (i32, i32) {
    %c0_i32 = arith.constant 0 : i32
    %c0_i32_0 = arith.constant 0 : i32
    return %arg0, %c0_i32 : i32, i32
  }
  func.func @transform_14(%arg0: i32) -> (i32, i32) {
    %c0_i32 = arith.constant 0 : i32
    %c0_i32_0 = arith.constant 0 : i32
    return %arg0, %c0_i32 : i32, i32
  }
  func.func @transform_15(%arg0: i32) -> (i32, i32) {
    %c0_i32 = arith.constant 0 : i32
    %c0_i32_0 = arith.constant 0 : i32
    return %arg0, %c0_i32 : i32, i32
  }
  func.func @transform_16(%arg0: i32) -> (i32, i32) {
    %c0_i32 = arith.constant 0 : i32
    %c0_i32_0 = arith.constant 0 : i32
    return %arg0, %c0_i32 : i32, i32
  }
}

</mosaic_0001>

<bundles_post_ra>
// kernel: simple_nn_forward.1
= control target key start
LH: loop header
LB: loop body
LE: loop exit
PB: predicated region body
PF: predicated region fallthrough
CT: control target
= control target key end

     0   :  { %s5620_s0 = inlined_call_operand.hbm [shape: f32[256,256], index: 0, kind: input, shape index: {}]   ;;  %s5621_s1 = inlined_call_operand.hbm [shape: f32[256,128], index: 1, kind: input, shape index: {}]   ;;  %s5622_s2 = inlined_call_operand.hbm [shape: f32[256,256], index: 2, kind: input, shape index: {}]   ;;  %s5623_s3 = inlined_call_operand.hbm [shape: bf16[256,128], index: 3, kind: input, shape index: {}]   ;;  %s5624_s4 = inlined_call_operand.vmem [shape: f32[1,128], index: 4, kind: input, shape index: {}]   ;;  %s5625_s5 = inlined_call_operand.hbm [shape: bf16[128,256], index: 5, kind: input, shape index: {}]   ;;  %s5626_s6 = inlined_call_operand.vmem [shape: f32[1,256], index: 6, kind: input, shape index: {}]   ;;  %s5627_s7 = inlined_call_operand.hbm [shape: bf16[128,128], index: 7, kind: input, shape index: {}]   ;;  %s5628_s8 = inlined_call_operand.vmem [shape: f32[1,128], index: 8, kind: input, shape index: {}]   ;;  %s5629_s9 = inlined_call_operand.hbm [shape: bf16[128,512], index: 9, kind: input, shape index: {}]   ;;  %s5630_s10 = inlined_call_operand.vmem [shape: f32[1,512], index: 10, kind: input, shape index: {}]   ;;  %s5631_s11 = inlined_call_operand.hbm [shape: f32[256,128], index: 11, kind: output, shape index: {0}]   ;;  %s5632_s12 = inlined_call_operand.hbm [shape: f32[256,128], index: 12, kind: output, shape index: {1}]   ;;  %s5633_s13 = inlined_call_operand.hbm [shape: f32[256,128], index: 13, kind: output, shape index: {2}]   ;;  %s5634_s14 = inlined_call_operand.hbm [shape: bf16[256,256], index: 14, kind: output, shape index: {3}]   ;;  %s5635_s15 = inlined_call_operand.hbm [shape: bf16[256,256], index: 15, kind: output, shape index: {4}]   ;;  %s5636_s16 = inlined_call_operand.hbm [shape: bf16[256,256], index: 16, kind: output, shape index: {5}]  }
   0x1   :  { %5665 = sst [smem:[#allocation37_spill]] %s5620_s0 }
   0x2   :  { %5666 = sst [smem:[#allocation38_spill]] %s5621_s1 }
   0x3   :  { %5667 = sst [smem:[#allocation39_spill]] %s5622_s2 }
   0x4   :  { %5668 = sst [smem:[#allocation40_spill]] %s5623_s3 }
   0x5   :  { %5669 = sst [smem:[#allocation41_spill]] %s5624_s4 }
   0x6   :  { %5670 = sst [smem:[#allocation42_spill]] %s5625_s5 }
   0x7   :  { %5671 = sst [smem:[#allocation43_spill]] %s5627_s7 }
   0x8   :  { %5672 = sst [smem:[#allocation44_spill]] %s5630_s10 }
   0x9   :  { %5673 = sst [smem:[#allocation45_spill]] %s5631_s11 }
   0xa   :  { %5674 = sst [smem:[#allocation46_spill]] %s5632_s12 }
   0xb   :  { %5675 = sst [smem:[#allocation47_spill]] %s5633_s13 }
   0xc   :  { %5676 = sst [smem:[#allocation48_spill]] %s5634_s14 }
   0xd   :  { %5677 = sst [smem:[#allocation49_spill]] %s5635_s15 }
   0xe   :  { %5678 = sst [smem:[#allocation50_spill]] %s5636_s16 }
   0xf   :  { %22 = vsyncpa [#allocation3], 0 }
  0x10   :  { %24 = vsyncpa [#allocation3 + $0x1], 0 }
  0x11   :  { %25 = vsyncpa [#allocation6], 0 }
  0x12   :  { %27 = vsyncpa [#allocation6 + $0x1], 0 }
  0x13   :  { %28 = vsyncpa [#allocation9], 0 }
  0x14   :  { %29 = vsyncpa [#allocation12], 0 }
  0x15   :  { %30 = vsyncpa [#allocation4], 0 }
  0x16   :  { %32 = vsyncpa [#allocation4 + $0x1], 0 }
  0x17   :  { %33 = vsyncpa [#allocation16], 0 }
  0x18   :  { %35 = vsyncpa [#allocation16 + $0x1], 0 }
  0x19   :  { %36 = vsyncpa [#allocation19], 0 }
  0x1a   :  { %38 = vsyncpa [#allocation19 + $0x1], 0 }
  0x1b   :  { %39 = vsyncpa [#allocation22], 0 }
  0x1c   :  { %41 = vsyncpa [#allocation22 + $0x1], 0  ;;  %s4294_s21 = smov 0   ;;  %s4296_s22 = smov 0  }
  0x1d   :  { %s4298_s23 = smov 0   ;;  %s4300_s24 = smov 0  }
  0x1e LB: > { %5679 = sst [smem:[#allocation31_spill]] %s4173_s21  ;;  %s4315_s25 = sadd.s32 4294967295, %s4185_s24   ;;  %s4185_s24 = sphi %s4300_s24, %s5726_s24   ;;  %s4181_s23 = sphi %s4298_s23, %s5728_s23   ;;  %s4177_s22 = sphi %s4296_s22, %s5730_s22   ;;  %s4173_s21 = sphi %s4294_s21, %s5729_s21  }
  0x1f   : > { %5680 = sst [smem:[#allocation32_spill]] %s4181_s23  ;;  %s5638_s26 = sadd.s32 4294967294, %s4185_s24  }
  0x20   : > { %p67_p0 = scmp.ne.s32.totalorder %s4177_s22, %s4173_s21  ;;  %p5643_p1 = scmp.eq.s32.totalorder %s4315_s25, 0 }
  0x21   : > { %p317_p3 = scmp.eq.s32.totalorder %s5638_s26, 1  ;;  %p3064_p5 = scmp.ge.s32.totalorder %s4185_s24, 1 }
  0x22   : > { %p4326_p4 = por %p5643_p1, %p67_p0  ;;  %p454_p7 = scmp.lt.s32.totalorder %s4185_s24, 3 }
  0x23   : > { %p4331_p6 = por %p317_p3, %p67_p0  ;;  %s4187_s30 = smov [#allocation8]  }
  0x24   : > { %s5681_s27 = scalar_select %p4326_p4, 1, 0 }
  0x25   : > { %s5682_s28 = scalar_select %p4331_p6, 1, 0 }
  0x26   : > { %p4336_p8 = pnand %p3064_p5, %p454_p7  ;;  %s466_s0 = sshll.u32 %s4187_s30, 4  ;;  %s4340_s0 = int_to_ptr.vmem [resolvable:$true] %s466_s0 }
  0x27   : > { %5683 = sst [smem:[#allocation33_spill]] %s5682_s28  ;;  %s4188_s18 = smov [#allocation11]  }
  0x28   : > { %s5684_s29 = scalar_select %p4336_p8, 1, 0 }
  0x29   : > { %p3464_p9 = pneg %p4336_p8  ;;  %s498_s19 = sshll.u32 %s4188_s18, 4  ;;  %s4351_s19 = int_to_ptr.vmem [resolvable:$true] %s498_s19 }
  0x2a   : > { %s5686_s3 = sld [smem:[#allocation40_spill]] }
  0x2b   : > { %p4347_p11 = pnand %p3464_p9, %p5643_p1 }
  0x2d   : > { %s5685_s17 = scalar_select %p4347_p11, 1, 0 }
  0x2e   : > { %p4361_p13 = pneg %p4347_p11 }
  0x30   : > { %s3753_s28 = scalar_lea.hbm %s5686_s3, 2048 }
  0x31   : > { %p3754_p12 = scmp.ne.s32.totalorder %s5686_s3, %s3753_s28  ;;  %p3760_p5 = scmp.lt.u32.totalorder %s3753_s28, %s5686_s3 }
  0x32   : > { %s5687_s16 = scalar_select %p4361_p13, 1, 0 }
  0x33   : > { %p3756_p0 = pnand %p4361_p13, %p3754_p12 }
  0x35   : > { %p3757_p3 = pneg %p3756_p0 }
  0x37   : > { %p3762_p7 = pnand %p3760_p5, %p3757_p3 }
  0x39   : > { %3765 = shalt.err (!%p3762_p7)
}
  0x3a   : > { %s3766_s21 = scalar_lea.vmem %s4340_s0, 2048  ;;  %p3774_p2 = scmp.lt.s32.totalorder %s4340_s0, %s4340_s0 }
  0x3b   : > { %p3767_p9 = scmp.ne.s32.totalorder %s4340_s0, %s3766_s21  ;;  %p3775_p6 = scmp.lt.s32.totalorder %s3766_s21, %s3766_s21 }
  0x3d   : > { %p3769_p10 = pnand %p3767_p9, %p4361_p13  ;;  %p3776_p12 = por %p3775_p6, %p3774_p2 }
  0x3f   : > { %p3770_p1 = pneg %p3769_p10 }
  0x41   : > { %p3777_p0 = pnand %p3776_p12, %p3770_p1 }
  0x43   : > { %3780 = shalt.err (!%p3777_p0)
}
  0x44   : > { %s4189_s26 = smov 64   ;;  %s4190_s15 = smov 4  }
  0x45   : > { %3467 = dma.hbm_to_vmem [thread:$0]  (!%p4347_p11), %s5686_s3, 2048, %s4340_s0, [#allocation9], %s4189_s26, %s4189_s26, %s4190_s15  }
  0x46   : > { %s5688_s7 = sld [smem:[#allocation43_spill]] }
  0x4c   : > { %s3781_s14 = scalar_lea.hbm %s5688_s7, 1024 }
  0x4d   : > { %p3782_p2 = scmp.ne.s32.totalorder %s5688_s7, %s3781_s14  ;;  %p3788_p10 = scmp.lt.u32.totalorder %s3781_s14, %s5688_s7 }
  0x4f   : > { %p3784_p1 = pnand %p3782_p2, %p4361_p13 }
  0x51   : > { %p3785_p6 = pneg %p3784_p1 }
  0x53   : > { %p3790_p3 = pnand %p3788_p10, %p3785_p6 }
  0x55   : > { %3793 = shalt.err (!%p3790_p3)
}
  0x56   : > { %s3794_s0 = scalar_lea.vmem %s4351_s19, 1024  ;;  %p3802_p12 = scmp.lt.s32.totalorder %s4351_s19, %s4351_s19 }
  0x57   : > { %p3795_p5 = scmp.ne.s32.totalorder %s4351_s19, %s3794_s0  ;;  %p3803_p0 = scmp.lt.s32.totalorder %s3794_s0, %s3794_s0 }
  0x59   : > { %p3797_p7 = pnand %p3795_p5, %p4361_p13  ;;  %p3804_p2 = por %p3803_p0, %p3802_p12 }
  0x5b   : > { %p3798_p9 = pneg %p3797_p7 }
  0x5d   : > { %p3805_p1 = pnand %p3804_p2, %p3798_p9 }
  0x5f   : > { %3808 = shalt.err (!%p3805_p1)
}
  0x60   : > { %3473 = dma.hbm_to_vmem [thread:$0]  (!%p4347_p11), %s5688_s7, 1024, %s4351_s19, [#allocation12], %s4189_s26, %s4189_s26, %s4190_s15  }
  0x61   : > { %s4406_s13 = sadd.s32 1, %s4185_s24   ;;  %s54_s14 = sadd.s32 1, %s4181_s23 }
  0x62   : > { %5689 = sst [smem:[#allocation34_spill]] %s4406_s13  ;;  %s51_s28 = ssub.s32 %s4185_s24, %s4406_s13 }
  0x63   : > { %p61_p6 = scmp.ne.s32.totalorder %s4181_s23, %s4177_s22  ;;  %p52_p10 = scmp.eq.s32.totalorder %s51_s28, 0 }
  0x64   : > { %p62_p3 = scmp.eq.s32.totalorder %s4185_s24, 0  ;;  %p5690_p5 = scmp.eq.s32.totalorder %s4315_s25, 1 }
  0x65   : > { %s4421_s30 = scalar_select %p52_p10, %s4181_s23, %s54_s14  }
  0x66   : > { %p4416_p7 = por %p5690_p5, %p61_p6  ;;  %p63_p9 = por %p62_p3, %p61_p6 }
  0x67   : > { %5693 = sst [smem:[#allocation36_spill]] %s4421_s30  ;;  %p3510_p12 = scmp.lt.s32.totalorder %s4185_s24, 2 }
  0x68   : > { %s5691_s20 = scalar_select %p4416_p7, 1, 0 }
  0x69   : > { %s4425_s18 = sand.u32 1, %s4181_s23   ;;  %s553_s19 = sand.u32 1, %s4185_s24  }
  0x6a   : > { %5692 = sst [smem:[#allocation35_spill]] %s5691_s20  ;;  %s3074_s26 = sshll.u32 %s4425_s18, 7 }
  0x6b   : > { %p4429_p0 = pnand %p3510_p12, %p63_p9  ;;  %s3242_s21 = sshll.u32 %s4185_s24, 11 }
  0x6c   : > { %s5695_s1 = sld [smem:[#allocation38_spill]]  ;;  %s557_s14 = scalar_lea.vmem [#allocation5], %s3074_s26 }
  0x6d   : > { %s5694_s15 = scalar_select %p4429_p0, 1, 0 }
  0x6e   : > { %s564_s28 = sshll.u32 %s557_s14, 4  ;;  %s4191_s3 = smov [#allocation10]   ;;  %s4439_s28 = int_to_ptr.vmem [resolvable:$true] %s564_s28 }
  0x6f   : > { %s4441_s7 = sshll.u32 %s4191_s3, 4  ;;  %s4443_s30 = scalar_lea.sflag [#allocation6], %s553_s19  ;;  %s483_s7 = int_to_ptr.vmem [resolvable:$true] %s4441_s7 }
  0x70   : > { %p4449_p1 = pneg %p4429_p0 }
  0x72   : > { %s4437_s11 = scalar_lea.hbm %s5695_s1, %s3242_s21  ;;  %s3814_s10 = scalar_lea.hbm %s5695_s1, 4096 }
  0x73   : > { %s3809_s23 = scalar_lea.hbm %s4437_s11, 2048  ;;  %p3815_p3 = scmp.lt.u32.totalorder %s4437_s11, %s5695_s1 }
  0x74   : > { %p3810_p2 = scmp.ne.s32.totalorder %s4437_s11, %s3809_s23  ;;  %p3816_p5 = scmp.lt.u32.totalorder %s3814_s10, %s3809_s23 }
  0x75   : > { %s5696_s0 = scalar_select %p4449_p1, 1, 0 }
  0x76   : > { %p3812_p6 = pnand %p4449_p1, %p3810_p2  ;;  %p3817_p9 = por %p3816_p5, %p3815_p3 }
  0x77   : > { %p3818_p12 = scmp.lt.u32.totalorder %s3809_s23, %s4437_s11 }
  0x78   : > { %p3813_p10 = pneg %p3812_p6 }
  0x79   : > { %p3819_p7 = por %p3818_p12, %p3817_p9 }
  0x7b   : > { %p3820_p4 = pnand %p3819_p7, %p3813_p10 }
  0x7d   : > { %3823 = shalt.err (!%p3820_p4)
}
  0x7e   : > { %s3824_s19 = scalar_lea.vmem %s4439_s28, 2048  ;;  %s4192_s26 = smov [#allocation5]  }
  0x7f   : > { %p3825_p2 = scmp.ne.s32.totalorder %s4439_s28, %s3824_s19  ;;  %s3829_s21 = sshll.u32 %s4192_s26, 4  ;;  %s3830_s21 = int_to_ptr.vmem [resolvable:$false] %s3829_s21 }
  0x80   : > { %s3831_s14 = scalar_lea.vmem %s3830_s21, 4096  ;;  %p3832_p11 = scmp.lt.s32.totalorder %s4439_s28, %s3830_s21 }
  0x81   : > { %p3827_p6 = pnand %p3825_p2, %p4449_p1  ;;  %p3833_p13 = scmp.lt.s32.totalorder %s3831_s14, %s3824_s19 }
  0x83   : > { %p3828_p8 = pneg %p3827_p6  ;;  %p3834_p3 = por %p3833_p13, %p3832_p11 }
  0x85   : > { %p3835_p5 = pnand %p3834_p3, %p3828_p8 }
  0x87   : > { %3838 = shalt.err (!%p3835_p5)
}
  0x88   : > { %s4193_s23 = smov 128   ;;  %s4194_s10 = smov 8  }
  0x89   : > { %3483 = dma.hbm_to_vmem [thread:$0]  (!%p4429_p0), %s4437_s11, 2048, %s4439_s28, %s4443_s30, %s4193_s23, %s4193_s23, %s4194_s10  }
  0x8a   : > { %s5697_s5 = sld [smem:[#allocation42_spill]]  ;;  %p5698_p8 = scmp.ne.s32.totalorder %s5687_s16, 0 }
  0x90   : > { %s3839_s1 = scalar_lea.hbm %s5697_s5, 2048 }
  0x91   : > { %p3840_p4 = scmp.ne.s32.totalorder %s5697_s5, %s3839_s1  ;;  %p3846_p7 = scmp.lt.u32.totalorder %s3839_s1, %s5697_s5 }
  0x93   : > { %p3842_p11 = pnand %p3840_p4, %p5698_p8 }
  0x95   : > { %p3843_p13 = pneg %p3842_p11 }
  0x97   : > { %p3848_p10 = pnand %p3846_p7, %p3843_p13 }
  0x99   : > { %3851 = shalt.err (!%p3848_p10)
}
  0x9a   : > { %s3852_s12 = scalar_lea.vmem %s483_s7, 2048  ;;  %p3860_p6 = scmp.lt.s32.totalorder %s483_s7, %s483_s7 }
  0x9b   : > { %p3853_p9 = scmp.ne.s32.totalorder %s483_s7, %s3852_s12  ;;  %p3861_p3 = scmp.lt.s32.totalorder %s3852_s12, %s3852_s12 }
  0x9d   : > { %p3855_p12 = pnand %p3853_p9, %p5698_p8  ;;  %p3862_p5 = por %p3861_p3, %p3860_p6 }
  0x9f   : > { %p3856_p2 = pneg %p3855_p12 }
  0xa1   : > { %p3863_p0 = pnand %p3862_p5, %p3856_p2 }
  0xa3   : > { %3866 = shalt.err (!%p3863_p0)
}
  0xa4   : > { %p5699_p4 = scmp.ne.s32.totalorder %s5685_s17, 0  ;;  %s4195_s1 = smov [#allocation13]  }
  0xa5   : > { %s514_s13 = sshll.u32 %s4195_s1, 4  ;;  %s3867_s21 = scalar_lea.hbm %s5629_s9, 4096  ;;  %s515_s13 = int_to_ptr.vmem [resolvable:$true] %s514_s13 }
  0xa6   : > { %3470 = dma.hbm_to_vmem [thread:$0]  (!%p5699_p4), %s5697_s5, 2048, %s483_s7, [#allocation9], %s4193_s23, %s4193_s23, %s4194_s10  }
  0xa7   : > { %p3868_p11 = scmp.ne.s32.totalorder %s5629_s9, %s3867_s21  ;;  %p3874_p7 = scmp.lt.u32.totalorder %s3867_s21, %s5629_s9 }
  0xa9   : > { %p3870_p0 = pnand %p3868_p11, %p5698_p8 }
  0xab   : > { %p3871_p13 = pneg %p3870_p0 }
  0xad   : > { %p3876_p10 = pnand %p3874_p7, %p3871_p13 }
  0xaf   : > { %3879 = shalt.err (!%p3876_p10)
}
  0xb0   : > { %s3880_s7 = scalar_lea.vmem %s515_s13, 4096  ;;  %p3888_p6 = scmp.lt.s32.totalorder %s515_s13, %s515_s13 }
  0xb1   : > { %p3881_p9 = scmp.ne.s32.totalorder %s515_s13, %s3880_s7  ;;  %p3889_p3 = scmp.lt.s32.totalorder %s3880_s7, %s3880_s7 }
  0xb3   : > { %p3883_p12 = pnand %p3881_p9, %p5698_p8  ;;  %p3890_p5 = por %p3889_p3, %p3888_p6 }
  0xb5   : > { %p3884_p2 = pneg %p3883_p12 }
  0xb7   : > { %p3891_p1 = pnand %p3890_p5, %p3884_p2 }
  0xb9   : > { %3894 = shalt.err (!%p3891_p1)
}
  0xba   : > { %s4196_s23 = smov 256   ;;  %s4197_s20 = smov 16  }
  0xbb   : > { %3476 = dma.hbm_to_vmem [thread:$0]  (!%p5699_p4), %s5629_s9, 4096, %s515_s13, [#allocation12], %s4196_s23, %s4196_s23, %s4197_s20  }
  0xbc   : > { %s3070_s11 = sshll.u32 %s4425_s18, 8  ;;  %s3241_s28 = sshll.u32 %s4185_s24, 12 }
  0xbd   : > { %s5700_s26 = sld [smem:[#allocation37_spill]]  ;;  %s535_s17 = scalar_lea.vmem [#allocation2], %s3070_s11 }
  0xbe   : > { %s543_s19 = sshll.u32 %s535_s17, 4  ;;  %s532_s14 = scalar_lea.sflag [#allocation3], %s4425_s18  ;;  %s4524_s19 = int_to_ptr.vmem [resolvable:$true] %s543_s19 }
  0xbf   : > { %p5701_p8 = scmp.ne.s32.totalorder %s5696_s0, 0 }
  0xc3   : > { %s4520_s21 = scalar_lea.hbm %s5700_s26, %s3241_s28  ;;  %s3900_s16 = scalar_lea.hbm %s5700_s26, 8192 }
  0xc4   : > { %s3895_s12 = scalar_lea.hbm %s4520_s21, 4096  ;;  %p3901_p0 = scmp.lt.u32.totalorder %s4520_s21, %s5700_s26 }
  0xc5   : > { %p3896_p1 = scmp.ne.s32.totalorder %s4520_s21, %s3895_s12  ;;  %p3902_p13 = scmp.lt.u32.totalorder %s3900_s16, %s3895_s12 }
  0xc6   : > { %p3904_p10 = scmp.lt.u32.totalorder %s3895_s12, %s4520_s21 }
  0xc7   : > { %p3898_p4 = pnand %p3896_p1, %p5701_p8  ;;  %p3903_p7 = por %p3902_p13, %p3901_p0 }
  0xc9   : > { %p3899_p11 = pneg %p3898_p4  ;;  %p3905_p9 = por %p3904_p10, %p3903_p7 }
  0xcb   : > { %p3906_p12 = pnand %p3905_p9, %p3899_p11 }
  0xcd   : > { %3909 = shalt.err (!%p3906_p12)
}
  0xce   : > { %s3910_s3 = scalar_lea.vmem %s4524_s19, 4096  ;;  %s4198_s17 = smov [#allocation2]  }
  0xcf   : > { %p3911_p2 = scmp.ne.s32.totalorder %s4524_s19, %s3910_s3  ;;  %s3915_s13 = sshll.u32 %s4198_s17, 4  ;;  %s3916_s13 = int_to_ptr.vmem [resolvable:$false] %s3915_s13 }
  0xd0   : > { %s3917_s7 = scalar_lea.vmem %s3916_s13, 8192  ;;  %p3918_p5 = scmp.lt.s32.totalorder %s4524_s19, %s3916_s13 }
  0xd1   : > { %p3913_p6 = pnand %p3911_p2, %p5701_p8  ;;  %p3919_p1 = scmp.lt.s32.totalorder %s3917_s7, %s3910_s3 }
  0xd3   : > { %p3914_p3 = pneg %p3913_p6  ;;  %p3920_p4 = por %p3919_p1, %p3918_p5 }
  0xd5   : > { %p3921_p0 = pnand %p3920_p4, %p3914_p3 }
  0xd7   : > { %3924 = shalt.err (!%p3921_p0)
}
  0xd8   : > { %p5702_p11 = scmp.ne.s32.totalorder %s5694_s15, 0  ;;  %s5703_s2 = sld [smem:[#allocation39_spill]] }
  0xd9   : > { %s578_s1 = scalar_lea.vmem [#allocation7], %s3070_s11 }
  0xda   : > { %3480 = dma.hbm_to_vmem [thread:$0]  (!%p5702_p11), %s4520_s21, 4096, %s4524_s19, %s532_s14, %s4196_s23, %s4196_s23, %s4197_s20  }
  0xdb   : > { %s586_s3 = sshll.u32 %s578_s1, 4  ;;  %s4562_s3 = int_to_ptr.vmem [resolvable:$true] %s586_s3 }
  0xde   : > { %s4558_s10 = scalar_lea.hbm %s5703_s2, %s3241_s28  ;;  %s3930_s14 = scalar_lea.hbm %s5703_s2, 8192 }
  0xdf   : > { %s3925_s17 = scalar_lea.hbm %s4558_s10, 4096  ;;  %p3931_p9 = scmp.lt.u32.totalorder %s4558_s10, %s5703_s2 }
  0xe0   : > { %p3926_p13 = scmp.ne.s32.totalorder %s4558_s10, %s3925_s17  ;;  %p3932_p12 = scmp.lt.u32.totalorder %s3930_s14, %s3925_s17 }
  0xe1   : > { %p3934_p6 = scmp.lt.u32.totalorder %s3925_s17, %s4558_s10 }
  0xe2   : > { %p3928_p7 = pnand %p3926_p13, %p5701_p8  ;;  %p3933_p2 = por %p3932_p12, %p3931_p9 }
  0xe4   : > { %p3929_p10 = pneg %p3928_p7  ;;  %p3935_p3 = por %p3934_p6, %p3933_p2 }
  0xe6   : > { %p3936_p5 = pnand %p3935_p3, %p3929_p10 }
  0xe8   : > { %3939 = shalt.err (!%p3936_p5)
}
  0xe9   : > { %s3940_s18 = scalar_lea.vmem %s4562_s3, 4096  ;;  %s4199_s11 = smov [#allocation7]  }
  0xea   : > { %p3941_p1 = scmp.ne.s32.totalorder %s4562_s3, %s3940_s18  ;;  %s3945_s7 = sshll.u32 %s4199_s11, 4  ;;  %s3946_s7 = int_to_ptr.vmem [resolvable:$false] %s3945_s7 }
  0xeb   : > { %s3947_s12 = scalar_lea.vmem %s3946_s7, 8192  ;;  %p3948_p13 = scmp.lt.s32.totalorder %s4562_s3, %s3946_s7 }
  0xec   : > { %p3943_p4 = pnand %p3941_p1, %p5701_p8  ;;  %p3949_p7 = scmp.lt.s32.totalorder %s3947_s12, %s3940_s18 }
  0xee   : > { %p3944_p0 = pneg %p3943_p4  ;;  %p3950_p9 = por %p3949_p7, %p3948_p13 }
  0xf0   : > { %p3951_p12 = pnand %p3950_p9, %p3944_p0 }
  0xf2   : > { %3954 = shalt.err (!%p3951_p12)
}
  0xf3   : > { %3486 = dma.hbm_to_vmem [thread:$0]  (!%p5702_p11), %s4558_s10, 4096, %s4562_s3, %s4443_s30, %s4196_s23, %s4196_s23, %s4197_s20  }
  0xf4   : > { %p5704_p8 = scmp.ne.s32.totalorder %s5684_s29, 0 }
  0xf5   : > { %s4592_s0 = sand.u32 (!%p5704_p8), 1, %s4177_s22   ;;  %p5705_p10 = scmp.ne.s32.totalorder (!%p5704_p8), %s5681_s27, 0 }
  0xf6   : > { %598 = sbr.rel (%p5704_p8) target bundleno = 1342 (0x53e), region = 64  ;;  %s3082_s16 = sshll.u32 (!%p5704_p8), %s4592_s0, 8 }
  0xf7   : > { %s601_s1 = scalar_lea.sflag (!%p5704_p8), [#allocation3], %s4592_s0  ;;  %s4596_s17 = scalar_lea.vmem (!%p5704_p8), [#allocation2], %s3082_s16 }
  0xfd   : > { %4140 = dma.done.wait (%p5705_p10), %s601_s1, 4096  }
  0xfe   : > { %4142 = vsyncadd (%p5705_p10), %s601_s1, 4294963200  ;;  %s4603_s29 = sand.u32 1, %s4315_s25   ;;  %s4606_s30 = sshll.u32 %s4592_s0, 7 }
  0xff   : > { %s610_s15 = scalar_lea.sflag [#allocation6], %s4603_s29  ;;  %s4610_s23 = scalar_lea.vmem [#allocation5], %s4606_s30 }
 0x100   : > { %4144 = dma.done.wait (%p5705_p10), %s610_s15, 6144  }
 0x101   : > { %4146 = vsyncadd (%p5705_p10), %s610_s15, 4294961152  ;;  %s4616_s20 = scalar_lea.vmem [#allocation7], %s3082_s16  ;;  %p5706_p11 = scmp.eq.s32.totalorder %s4315_s25, 0 }
 0x103   : > { %4148 = dma.done.wait (%p5706_p11), [#allocation9], 4096   ;;  %p5707_p2 = pmov %p5706_p11 }
 0x105   : > { %4150 = vsyncadd (%p5707_p2), [#allocation9], 4294963200  ;;  %p5708_p6 = pmov %p5707_p2 }
 0x106   : > { %p5709_p3 = pmov %p5707_p2 }
 0x107   : > { %4152 = dma.done.wait (%p5708_p6), [#allocation12], 5120  }
 0x108   : > { %4154 = vsyncadd (%p5709_p3), [#allocation12], 4294962176  ;;  %v3561_v0 = vld [vmem:[#allocation8 + $0x40] sm:$0xff]   ;;  %v3563_v2 = vld [vmem:[#allocation8 + $0x48] sm:$0xff]   ;;  %s5710_s4 = sld [smem:[#allocation41_spill]]  ;;  %s4709_s19 = scalar_lea.vmem [#allocation14], %s4606_s30 }
 0x109   : > { %v3562_v1 = vld [vmem:[#allocation8] sm:$0xff]   ;;  %3302 = vmatprep.subr.bf16.mxu0 %v3561_v0  ;;  %v3564_v3 = vld [vmem:[#allocation8 + $0x8] sm:$0xff]   ;;  %v3565_v4 = vld [vmem:[#allocation8 + $0x50] sm:$0xff]   ;;  %s4714_s14 = scalar_lea.vmem [#allocation15], %s4606_s30  ;;  %s4751_s28 = scalar_lea.vmem [#allocation17], %s4606_s30 }
 0x10a   : > { %3303 = vmatpush3.bf16.msra.mxu0 %v3562_v1  ;;  %v3566_v5 = vld [vmem:[#allocation8 + $0x10] sm:$0xff]   ;;  %v3567_v6 = vld [vmem:[#allocation8 + $0x58] sm:$0xff]   ;;  %v3569_v8 = vld [vmem:[#allocation8 + $0x60] sm:$0xff]   ;;  %s5711_s11 = sld [smem:[#allocation35_spill]]  ;;  %s4957_s7 = sshll.u32 %s4315_s25, 11 }
 0x10b   : > { %3304 = vmatprep.subr.bf16.mxu0 %v3563_v2  ;;  %v3568_v7 = vld [vmem:[#allocation8 + $0x18] sm:$0xff]   ;;  %v3570_v9 = vld [vmem:[#allocation8 + $0x20] sm:$0xff]   ;;  %v3571_v10 = vld [vmem:[#allocation8 + $0x68] sm:$0xff]   ;;  %s5712_s1 = sld [smem:[#allocation46_spill]]  ;;  %s2688_s15 = sshll.u32 %s4714_s14, 4  ;;  %s4966_s15 = int_to_ptr.vmem [resolvable:$true] %s2688_s15 }
 0x10c   : > { %v733_v11 = vld [vmem:[%s4596_s17 + $0x8] sm:$0xff]  ;;  %v735_v12 = vld [vmem:[%s4596_s17 + $0x18] sm:$0xff]  ;;  %v3573_v15 = vld [vmem:[#allocation8 + $0x70] sm:$0xff]   ;;  %s3955_s27 = scalar_lea.vmem %s4966_s15, 2048  ;;  %s4201_s25 = smov [#allocation15]  }
 0x10d   : > { %v765_v13 = vpack.c.bf16 %v735_v12, %v733_v11  ;;  %v3572_v14 = vld [vmem:[#allocation8 + $0x28] sm:$0xff]   ;;  %v3574_v16 = vld [vmem:[#allocation8 + $0x30] sm:$0xff]   ;;  %v3575_v17 = vld [vmem:[#allocation8 + $0x78] sm:$0xff]   ;;  %p3956_p5 = scmp.ne.s32.totalorder %s4966_s15, %s3955_s27  ;;  %s3959_s10 = sshll.u32 %s4201_s25, 4  ;;  %s3960_s10 = int_to_ptr.vmem [resolvable:$false] %s3959_s10 }
 0x10e   : > { %3305 = vmatpush3.bf16.msra.mxu0 %v3564_v3  ;;  %v3576_v18 = vld [vmem:[#allocation8 + $0x38] sm:$0xff]   ;;  %v732_v19 = vld [vmem:[%s4596_s17] sm:$0xff]  ;;  %v734_v20 = vld [vmem:[%s4596_s17 + $0x10] sm:$0xff]  ;;  %s3961_s3 = scalar_lea.vmem %s3960_s10, 4096  ;;  %p3962_p13 = scmp.lt.s32.totalorder %s4966_s15, %s3960_s10 }
 0x10f   : > { %3306 = vmatprep.subr.bf16.mxu0 %v3565_v4  ;;  %947 = vmatprep.mubr.bf16.mxu0 %v765_v13  ;;  %v737_v21 = vld [vmem:[%s4596_s17 + $0x28] sm:$0xff]  ;;  %v739_v22 = vld [vmem:[%s4596_s17 + $0x38] sm:$0xff]  ;;  %v764_v26 = vpack.c.bf16 %v734_v20, %v732_v19  ;;  %v736_v31 = vld [vmem:[%s4596_s17 + $0x20] sm:$0xff]  ;;  %p3963_p7 = scmp.lt.s32.totalorder %s3961_s3, %s3955_s27 }
 0x110   : > { %v3577_v23 = vld [vmem:[#allocation10 + $0x4] ss:$8 sps:$4 sm:$0xff]   ;;  %v3579_v24 = vld [vmem:[#allocation10] ss:$8 sps:$4 sm:$0xff]   ;;  %v3580_v25 = vld [vmem:[#allocation10 + $0x14] ss:$8 sps:$4 sm:$0xff]   ;;  %v767_v28 = vpack.c.bf16 %v739_v22, %v737_v21 }
 0x111   : > { %1144 = vmatprep.subr.bf16.mxu1 %v3577_v23  ;;  %v3582_v27 = vld [vmem:[#allocation10 + $0x10] ss:$8 sps:$4 sm:$0xff]   ;;  %v3583_v29 = vld [vmem:[#allocation10 + $0x24] ss:$8 sps:$4 sm:$0xff]   ;;  %v3585_v30 = vld [vmem:[#allocation10 + $0x20] ss:$8 sps:$4 sm:$0xff]   ;;  %p3964_p9 = por %p3963_p7, %p3962_p13 }
 0x112   : > { %3307 = vmatpush3.bf16.msra.mxu0 %v3566_v5  ;;  %1145 = vmatpush1.bf16.msra.mxu1 %v3579_v24  ;;  %v738_v32 = vld [vmem:[%s4596_s17 + $0x30] sm:$0xff]  ;;  %v741_v34 = vld [vmem:[%s4596_s17 + $0x48] sm:$0xff]  ;;  %v743_v35 = vld [vmem:[%s4596_s17 + $0x58] sm:$0xff]  ;;  %p5713_p1 = scmp.ne.s32.totalorder %s5711_s11, 0 }
 0x113   : > { %3308 = vmatprep.subr.bf16.mxu0 %v3567_v6  ;;  %1146 = vmatprep.subr.bf16.mxu1 %v3580_v25  ;;  %v3586_v33 = vld [vmem:[#allocation10 + $0x34] ss:$8 sps:$4 sm:$0xff]   ;;  %v3588_v36 = vld [vmem:[#allocation10 + $0x30] ss:$8 sps:$4 sm:$0xff]   ;;  %v3589_v37 = vld [vmem:[#allocation10 + $0x44] ss:$8 sps:$4 sm:$0xff]   ;;  %v766_v38 = vpack.c.bf16 %v738_v32, %v736_v31  ;;  %v769_v39 = vpack.c.bf16 %v743_v35, %v741_v34 }
 0x114   : > { %v3591_v40 = vld [vmem:[#allocation10 + $0x40] ss:$8 sps:$4 sm:$0xff]   ;;  %v742_v42 = vld [vmem:[%s4596_s17 + $0x50] sm:$0xff]  ;;  %v747_v44 = vld [vmem:[%s4596_s17 + $0x78] sm:$0xff]  ;;  %p3957_p4 = pnand %p3956_p5, %p5713_p1 }
 0x115   : > { %v740_v41 = vld [vmem:[%s4596_s17 + $0x40] sm:$0xff]  ;;  %v745_v43 = vld [vmem:[%s4596_s17 + $0x68] sm:$0xff]  ;;  %v746_v48 = vld [vmem:[%s4596_s17 + $0x70] sm:$0xff] }
 0x116   : > { %3309 = vmatpush3.bf16.msra.mxu0 %v3568_v7  ;;  %1147 = vmatpush1.bf16.msra.mxu1 %v3582_v27  ;;  %v768_v45 = vpack.c.bf16 %v742_v42, %v740_v41  ;;  %v771_v46 = vpack.c.bf16 %v747_v44, %v745_v43  ;;  %v744_v47 = vld [vmem:[%s4596_s17 + $0x60] sm:$0xff]  ;;  %v749_v49 = vld [vmem:[%s4596_s17 + $0x88] sm:$0xff]  ;;  %v751_v50 = vld [vmem:[%s4596_s17 + $0x98] sm:$0xff]  ;;  %p3958_p0 = pneg %p3957_p4 }
 0x117   : > { %3310 = vmatprep.subr.bf16.mxu0 %v3569_v8  ;;  %1148 = vmatprep.subr.bf16.mxu1 %v3583_v29  ;;  %v770_v51 = vpack.c.bf16 %v746_v48, %v744_v47  ;;  %v773_v52 = vpack.c.bf16 %v751_v50, %v749_v49  ;;  %v748_v53 = vld [vmem:[%s4596_s17 + $0x80] sm:$0xff]  ;;  %v750_v54 = vld [vmem:[%s4596_s17 + $0x90] sm:$0xff]  ;;  %v753_v55 = vld [vmem:[%s4596_s17 + $0xa8] sm:$0xff] }
 0x118   : > { %v755_v56 = vld [vmem:[%s4596_s17 + $0xb8] sm:$0xff]  ;;  %v772_v57 = vpack.c.bf16 %v750_v54, %v748_v53  ;;  %v752_v59 = vld [vmem:[%s4596_s17 + $0xa0] sm:$0xff]  ;;  %v754_v60 = vld [vmem:[%s4596_s17 + $0xb0] sm:$0xff]  ;;  %p3965_p12 = pnand %p3964_p9, %p3958_p0 }
 0x119   : > { %v775_v58 = vpack.c.bf16 %v755_v56, %v753_v55  ;;  %v757_v61 = vld [vmem:[%s4596_s17 + $0xc8] sm:$0xff]  ;;  %v759_v62 = vld [vmem:[%s4596_s17 + $0xd8] sm:$0xff]  ;;  %v774_v63 = vpack.c.bf16 %v754_v60, %v752_v59  ;;  %v756_v1 = vld [vmem:[%s4596_s17 + $0xc0] sm:$0xff] }
 0x11a   : > { %3311 = vmatpush3.bf16.msra.mxu0 %v3570_v9  ;;  %1149 = vmatpush1.bf16.msra.mxu1 %v3585_v30  ;;  %v777_v0 = vpack.c.bf16 %v759_v62, %v757_v61  ;;  %v758_v2 = vld [vmem:[%s4596_s17 + $0xd0] sm:$0xff]  ;;  %v761_v3 = vld [vmem:[%s4596_s17 + $0xe8] sm:$0xff]  ;;  %v763_v4 = vld [vmem:[%s4596_s17 + $0xf8] sm:$0xff] }
 0x11b   : > { %3312 = vmatprep.subr.bf16.mxu0 %v3571_v10  ;;  %1150 = vmatprep.subr.bf16.mxu1 %v3586_v33  ;;  %v776_v5 = vpack.c.bf16 %v758_v2, %v756_v1  ;;  %v779_v6 = vpack.c.bf16 %v763_v4, %v761_v3  ;;  %v760_v7 = vld [vmem:[%s4596_s17 + $0xe0] sm:$0xff]  ;;  %v762_v8 = vld [vmem:[%s4596_s17 + $0xf0] sm:$0xff]  ;;  %v3604_v20 = vld [vmem:[#allocation11 + $0x18] sm:$0xff]   ;;  %s4963_s17 = scalar_lea.hbm %s5712_s1, %s4957_s7 }
 0x11c   : > { %v778_v9 = vpack.c.bf16 %v762_v8, %v760_v7  ;;  %v3592_v10 = vld [vmem:[#allocation10 + $0x54] ss:$8 sps:$4 sm:$0xff]   ;;  %v3594_v11 = vld [vmem:[#allocation10 + $0x50] ss:$8 sps:$4 sm:$0xff]   ;;  %v3595_v12 = vld [vmem:[#allocation10 + $0x64] ss:$8 sps:$4 sm:$0xff]  }
 0x11d   : > { %v3597_v13 = vld [vmem:[#allocation10 + $0x60] ss:$8 sps:$4 sm:$0xff]   ;;  %v3603_v19 = vld [vmem:[#allocation11 + $0x10] sm:$0xff]  }
 0x11e   : > { %3313 = vmatpush3.bf16.msra.mxu0 %v3572_v14  ;;  %1151 = vmatpush1.bf16.msra.mxu1 %v3588_v36  ;;  %v3598_v14 = vld [vmem:[#allocation10 + $0x74] ss:$8 sps:$4 sm:$0xff]   ;;  %v4662_v22 = vld [vmem:[%s5710_s4] ss:$0 sm:$0xff] }
 0x11f   : > { %3314 = vmatprep.subr.bf16.mxu0 %v3573_v15  ;;  %1152 = vmatprep.subr.bf16.mxu1 %v3589_v37  ;;  %v3600_v15 = vld [vmem:[#allocation10 + $0x70] ss:$8 sps:$4 sm:$0xff]  }
 0x122   : > { %3315 = vmatpush3.bf16.msra.mxu0 %v3574_v16  ;;  %1153 = vmatpush1.bf16.msra.mxu1 %v3591_v40  ;;  %v4200_v16 = vmov 0  }
 0x123   : > { %3316 = vmatprep.subr.bf16.mxu0 %v3575_v17  ;;  %1154 = vmatprep.subr.bf16.mxu1 %v3592_v10  ;;  %v3601_v17 = vld [vmem:[#allocation11] sm:$0xff]  }
 0x124   : > { %1176 = vmatprep.mubr.bf16.mxu1 %v4200_v16 }
 0x126   : > { %3317 = vmatpush3.bf16.msra.mxu0 %v3576_v18  ;;  %1155 = vmatpush1.bf16.msra.mxu1 %v3594_v11  ;;  %v3602_v18 = vld [vmem:[#allocation11 + $0x8] sm:$0xff]  }
 0x127   : > { %1156 = vmatprep.subr.bf16.mxu1 %v3595_v12  ;;  %3382 = vmatprep.subr.bf16.mxu0 %v3601_v17 }
 0x129   : > { %948 = vmatmul.mubr.bf16.vlgmr.msra.gmra.mrb[0].mxu0 %v764_v26 }
 0x12a   : > { %955 = vmatprep.mubr.bf16.mxu0 %v767_v28  ;;  %1157 = vmatpush1.bf16.msra.mxu1 %v3597_v13 }
 0x12b   : > { %1158 = vmatprep.subr.bf16.mxu1 %v3598_v14  ;;  %3383 = vmatpush3.bf16.msra.mxu0 %v3601_v17 }
 0x12c   : > { %3384 = vmatprep.subr.bf16.mxu0 %v3602_v18 }
 0x12e   : > { %1159 = vmatpush1.bf16.msra.mxu1 %v3600_v15 }
 0x12f   : > { %3385 = vmatpush3.bf16.msra.mxu0 %v3602_v18 }
 0x130   : > { %3386 = vmatprep.subr.bf16.mxu0 %v3603_v19 }
 0x131   : > { %956 = vmatmul.mubr.bf16.gmra.mrb[4].mxu0 %v766_v38 }
 0x132   : > { %963 = vmatprep.mubr.bf16.mxu0 %v769_v39 }
 0x133   : > { %3387 = vmatpush3.bf16.msra.mxu0 %v3603_v19 }
 0x134   : > { %3388 = vmatprep.subr.bf16.mxu0 %v3604_v20 }
 0x137   : > { %3389 = vmatpush3.bf16.msra.mxu0 %v3604_v20 }
 0x139   : > { %964 = vmatmul.mubr.bf16.gmra.mrb[8].mxu0 %v768_v45 }
 0x13a   : > { %971 = vmatprep.mubr.bf16.mxu0 %v771_v46 }
 0x141   : > { %972 = vmatmul.mubr.bf16.gmra.mrb[12].mxu0 %v770_v51 }
 0x142   : > { %979 = vmatprep.mubr.bf16.mxu0 %v773_v52 }
 0x149   : > { %980 = vmatmul.mubr.bf16.gmra.mrb[16].mxu0 %v772_v57 }
 0x14a   : > { %987 = vmatprep.mubr.bf16.mxu0 %v775_v58 }
 0x151   : > { %988 = vmatmul.mubr.bf16.gmra.mrb[20].mxu0 %v774_v63 }
 0x152   : > { %995 = vmatprep.mubr.bf16.mxu0 %v777_v0 }
 0x159   : > { %996 = vmatmul.mubr.bf16.gmra.mrb[24].mxu0 %v776_v5 }
 0x15a   : > { %1003 = vmatprep.mubr.bf16.mxu0 %v779_v6 }
 0x161   : > { %1004 = vmatmul.mubr.bf16.gmra.mrb[28].mxu0 %v778_v9 }
 0x1fc   : > { %v3318_v21 = vpop.f32.mrb[0].mxu0 }
 0x1fd   : > { %v3319_v23 = vpop.f32.mrb[1].mxu0 }
 0x1fe   : > { %v3320_v24 = vadd.f32 %v3319_v23, %v3318_v21  ;;  %v3321_v25 = vpop.f32.mrb[2].mxu0 }
 0x1ff   : > { %v3322_v26 = vpop.f32.mrb[3].mxu0 }
 0x200   : > { %v950_v27 = vadd.f32 %v3320_v24, %v4662_v22  ;;  %v3323_v28 = vadd.f32 %v3322_v26, %v3321_v25 }
 0x202   : > { %v953_v29 = vadd.f32 %v3323_v28, %v4662_v22  ;;  %v1012_v30 = vmax.f32 %v950_v27, 0.0 }
 0x204   : > { %v1013_v31 = vmax.f32 %v953_v29, 0.0  ;;  %v3324_v32 = vpop.f32.mrb[4].mxu0 }
 0x205   : > { %v3325_v33 = vpop.f32.mrb[5].mxu0 }
 0x206   : > { %v3326_v34 = vadd.f32 %v3325_v33, %v3324_v32  ;;  %v3327_v35 = vpop.f32.mrb[6].mxu0  ;;  %v1028_v36 = vpack.c.bf16 %v1013_v31, %v1012_v30 }
 0x207   : > { %v3328_v37 = vpop.f32.mrb[7].mxu0 }
 0x208   : > { %v958_v38 = vadd.f32 %v3326_v34, %v4662_v22  ;;  %v3329_v39 = vadd.f32 %v3328_v37, %v3327_v35  ;;  %1177 = vmatmul.mubr.bf16.vlgmr.msra.gmra.mrb[0].mxu1 %v1028_v36 }
 0x209   : > { %1186 = vmatprep.mubr.bf16.mxu1 %v4200_v16 }
 0x20a   : > { %v961_v40 = vadd.f32 %v3329_v39, %v4662_v22  ;;  %v1014_v41 = vmax.f32 %v958_v38, 0.0 }
 0x20c   : > { %v1015_v42 = vmax.f32 %v961_v40, 0.0  ;;  %v3330_v43 = vpop.f32.mrb[8].mxu0 }
 0x20d   : > { %v3331_v44 = vpop.f32.mrb[9].mxu0 }
 0x20e   : > { %v3332_v45 = vadd.f32 %v3331_v44, %v3330_v43  ;;  %v3333_v46 = vpop.f32.mrb[10].mxu0  ;;  %v1029_v47 = vpack.c.bf16 %v1015_v42, %v1014_v41 }
 0x20f   : > { %v3334_v48 = vpop.f32.mrb[11].mxu0 }
 0x210   : > { %v966_v49 = vadd.f32 %v3332_v45, %v4662_v22  ;;  %v3335_v50 = vadd.f32 %v3334_v48, %v3333_v46  ;;  %1187 = vmatmul.mubr.bf16.gmra.mrb[4].mxu1 %v1029_v47  ;;  %v3605_v48 = vld [vmem:[#allocation11 + $0x20] sm:$0xff]  }
 0x211   : > { %1196 = vmatprep.mubr.bf16.mxu1 %v4200_v16  ;;  %3390 = vmatprep.subr.bf16.mxu0 %v3605_v48 }
 0x212   : > { %v969_v51 = vadd.f32 %v3335_v50, %v4662_v22  ;;  %v1016_v52 = vmax.f32 %v966_v49, 0.0  ;;  %3391 = vmatpush3.bf16.msra.mxu0 %v3605_v48  ;;  %v3606_v49 = vld [vmem:[#allocation11 + $0x28] sm:$0xff]   ;;  %v3607_v50 = vld [vmem:[#allocation11 + $0x30] sm:$0xff]  }
 0x213   : > { %3392 = vmatprep.subr.bf16.mxu0 %v3606_v49 }
 0x214   : > { %v1017_v53 = vmax.f32 %v969_v51, 0.0  ;;  %v3336_v54 = vpop.f32.mrb[12].mxu0  ;;  %v3608_v51 = vld [vmem:[#allocation11 + $0x38] sm:$0xff]  }
 0x215   : > { %v3337_v55 = vpop.f32.mrb[13].mxu0 }
 0x216   : > { %v3338_v56 = vadd.f32 %v3337_v55, %v3336_v54  ;;  %v3339_v57 = vpop.f32.mrb[14].mxu0  ;;  %v1030_v58 = vpack.c.bf16 %v1017_v53, %v1016_v52  ;;  %3393 = vmatpush3.bf16.msra.mxu0 %v3606_v49  ;;  %v3609_v52 = vld [vmem:[#allocation13] ss:$16 sps:$4 sm:$0xff]   ;;  %v3614_v53 = vld [vmem:[#allocation13 + $0x24] ss:$16 sps:$4 sm:$0xff]  }
 0x217   : > { %v3340_v59 = vpop.f32.mrb[15].mxu0  ;;  %3394 = vmatprep.subr.bf16.mxu0 %v3607_v50  ;;  %v3612_v54 = vld [vmem:[#allocation13 + $0x20] ss:$16 sps:$4 sm:$0xff]   ;;  %v4688_v55 = vld [vmem:[#allocation13 + $0xc] ss:$16 sps:$4 sm:$0xff]  }
 0x218   : > { %v974_v60 = vadd.f32 %v3338_v56, %v4662_v22  ;;  %v3341_v61 = vadd.f32 %v3340_v59, %v3339_v57  ;;  %1197 = vmatmul.mubr.bf16.gmra.mrb[8].mxu1 %v1030_v58  ;;  %v3617_v56 = vld [vmem:[#allocation13 + $0x44] ss:$16 sps:$4 sm:$0xff]   ;;  %v3615_v57 = vld [vmem:[#allocation13 + $0x40] ss:$16 sps:$4 sm:$0xff]  }
 0x219   : > { %1206 = vmatprep.mubr.bf16.mxu1 %v4200_v16  ;;  %v3620_v58 = vld [vmem:[#allocation13 + $0x64] ss:$16 sps:$4 sm:$0xff]   ;;  %v3618_v59 = vld [vmem:[#allocation13 + $0x60] ss:$16 sps:$4 sm:$0xff]  }
 0x21a   : > { %v977_v62 = vadd.f32 %v3341_v61, %v4662_v22  ;;  %v1018_v63 = vmax.f32 %v974_v60, 0.0  ;;  %3395 = vmatpush3.bf16.msra.mxu0 %v3607_v50  ;;  %v3623_v60 = vld [vmem:[#allocation13 + $0x84] ss:$16 sps:$4 sm:$0xff]   ;;  %v3621_v61 = vld [vmem:[#allocation13 + $0x80] ss:$16 sps:$4 sm:$0xff]  }
 0x21b   : > { %3396 = vmatprep.subr.bf16.mxu0 %v3608_v51 }
 0x21c   : > { %v1019_v0 = vmax.f32 %v977_v62, 0.0  ;;  %v3342_v1 = vpop.f32.mrb[16].mxu0  ;;  %v3632_v62 = vld [vmem:[#allocation13 + $0xa4] ss:$16 sps:$4 sm:$0xff]  }
 0x21d   : > { %v3343_v2 = vpop.f32.mrb[17].mxu0 }
 0x21e   : > { %v3344_v3 = vadd.f32 %v3343_v2, %v3342_v1  ;;  %v3345_v4 = vpop.f32.mrb[18].mxu0  ;;  %v1031_v5 = vpack.c.bf16 %v1019_v0, %v1018_v63  ;;  %3397 = vmatpush3.bf16.msra.mxu0 %v3608_v51  ;;  %v3630_v63 = vld [vmem:[#allocation13 + $0xa0] ss:$16 sps:$4 sm:$0xff]   ;;  %v3641_v0 = vld [vmem:[#allocation13 + $0xc4] ss:$16 sps:$4 sm:$0xff]   ;;  %v1054_v2 = vlaneseq }
 0x21f   : > { %v3346_v6 = vpop.f32.mrb[19].mxu0  ;;  %1880 = vmatprep.subr.bf16.mxu0 %v4688_v55  ;;  %v3639_v1 = vld [vmem:[#allocation13 + $0xc0] ss:$16 sps:$4 sm:$0xff]  }
 0x220   : > { %v982_v7 = vadd.f32 %v3344_v3, %v4662_v22  ;;  %v3347_v8 = vadd.f32 %v3346_v6, %v3345_v4  ;;  %1207 = vmatmul.mubr.bf16.gmra.mrb[12].mxu1 %v1031_v5  ;;  %v4691_v3 = vshrl.u32 %v1054_v2, 7  ;;  %v1052_v5 = vld [vmem:[%s5626_s6] sm:$0x3] }
 0x221   : > { %1216 = vmatprep.mubr.bf16.mxu1 %v4200_v16 }
 0x222   : > { %v985_v9 = vadd.f32 %v3347_v8, %v4662_v22  ;;  %v1020_v10 = vmax.f32 %v982_v7, 0.0  ;;  %v1056_v4 = vsub.s32 0, %v4691_v3  ;;  %v1060_v6 = vsub.s32 1, %v4691_v3 }
 0x224   : > { %v1021_v11 = vmax.f32 %v985_v9, 0.0  ;;  %v3348_v12 = vpop.f32.mrb[20].mxu0  ;;  %v4700_v7 = vrot.slane %v1052_v5, %v1056_v4  ;;  %v4704_v8 = vrot.slane %v1052_v5, %v1060_v6 }
 0x225   : > { %v3349_v13 = vpop.f32.mrb[21].mxu0 }
 0x226   : > { %v3350_v14 = vadd.f32 %v3349_v13, %v3348_v12  ;;  %v3351_v15 = vpop.f32.mrb[22].mxu0  ;;  %v1032_v17 = vpack.c.bf16 %v1021_v11, %v1020_v10 }
 0x227   : > { %v3352_v18 = vpop.f32.mrb[23].mxu0 }
 0x228   : > { %v990_v19 = vadd.f32 %v3350_v14, %v4662_v22  ;;  %v3353_v20 = vadd.f32 %v3352_v18, %v3351_v15  ;;  %1217 = vmatmul.mubr.bf16.gmra.mrb[16].mxu1 %v1032_v17 }
 0x229   : > { %1226 = vmatprep.mubr.bf16.mxu1 %v4200_v16 }
 0x22a   : > { %v993_v21 = vadd.f32 %v3353_v20, %v4662_v22  ;;  %v1022_v23 = vmax.f32 %v990_v19, 0.0 }
 0x22c   : > { %v1023_v24 = vmax.f32 %v993_v21, 0.0  ;;  %v3354_v25 = vpop.f32.mrb[24].mxu0 }
 0x22d   : > { %v3355_v26 = vpop.f32.mrb[25].mxu0 }
 0x22e   : > { %v3356_v27 = vadd.f32 %v3355_v26, %v3354_v25  ;;  %v3357_v28 = vpop.f32.mrb[26].mxu0  ;;  %v1033_v29 = vpack.c.bf16 %v1023_v24, %v1022_v23 }
 0x22f   : > { %v3358_v30 = vpop.f32.mrb[27].mxu0 }
 0x230   : > { %v998_v31 = vadd.f32 %v3356_v27, %v4662_v22  ;;  %v3359_v32 = vadd.f32 %v3358_v30, %v3357_v28  ;;  %1227 = vmatmul.mubr.bf16.gmra.mrb[20].mxu1 %v1033_v29 }
 0x231   : > { %1236 = vmatprep.mubr.bf16.mxu1 %v4200_v16 }
 0x232   : > { %v1001_v33 = vadd.f32 %v3359_v32, %v4662_v22  ;;  %v1024_v34 = vmax.f32 %v998_v31, 0.0 }
 0x234   : > { %v1025_v35 = vmax.f32 %v1001_v33, 0.0  ;;  %v3360_v36 = vpop.f32.mrb[28].mxu0 }
 0x235   : > { %v3361_v37 = vpop.f32.mrb[29].mxu0 }
 0x236   : > { %v3362_v38 = vadd.f32 %v3361_v37, %v3360_v36  ;;  %v3363_v39 = vpop.f32.mrb[30].mxu0  ;;  %v1034_v40 = vpack.c.bf16 %v1025_v35, %v1024_v34  ;;  %v1305_v36 = vld [vmem:[%s4610_s23] sm:$0xff] }
 0x237   : > { %v3364_v41 = vpop.f32.mrb[31].mxu0 }
 0x238   : > { %v1006_v42 = vadd.f32 %v3362_v38, %v4662_v22  ;;  %v3365_v43 = vadd.f32 %v3364_v41, %v3363_v39  ;;  %1237 = vmatmul.mubr.bf16.gmra.mrb[24].mxu1 %v1034_v40 }
 0x239   : > { %1246 = vmatprep.mubr.bf16.mxu1 %v4200_v16 }
 0x23a   : > { %v1009_v44 = vadd.f32 %v3365_v43, %v4662_v22  ;;  %v1026_v45 = vmax.f32 %v1006_v42, 0.0  ;;  %v3611_v22 = vld [vmem:[#allocation13 + $0x4] ss:$16 sps:$4 sm:$0xff]   ;;  %v1306_v42 = vld [vmem:[%s4610_s23 + $0x8] sm:$0xff] }
 0x23b   : > { %1767 = vmatprep.subr.bf16.mxu1 %v3611_v22 }
 0x23c   : > { %v1027_v46 = vmax.f32 %v1009_v44, 0.0  ;;  %1768 = vmatpush1.bf16.msra.mxu1 %v3609_v52 }
 0x23d   : > { %1769 = vmatprep.subr.bf16.mxu1 %v3614_v53  ;;  %v1307_v53 = vld [vmem:[%s4610_s23 + $0x10] sm:$0xff] }
 0x23e   : > { %v1035_v47 = vpack.c.bf16 %v1027_v46, %v1026_v45 }
 0x240   : > { %1247 = vmatmul.mubr.bf16.gmra.mrb[28].mxu1 %v1035_v47 }
 0x241   : > { %1799 = vmatprep.mubr.bf16.mxu1 %v4200_v16  ;;  %1770 = vmatpush1.bf16.msra.mxu1 %v3612_v54 }
 0x242   : > { %1771 = vmatprep.subr.bf16.mxu1 %v3617_v56 }
 0x245   : > { %1772 = vmatpush1.bf16.msra.mxu1 %v3615_v57 }
 0x246   : > { %1773 = vmatprep.subr.bf16.mxu1 %v3620_v58 }
 0x249   : > { %1774 = vmatpush1.bf16.msra.mxu1 %v3618_v59 }
 0x24a   : > { %1775 = vmatprep.subr.bf16.mxu1 %v3623_v60 }
 0x24d   : > { %1776 = vmatpush1.bf16.msra.mxu1 %v3621_v61  ;;  %v1308_v61 = vld [vmem:[%s4610_s23 + $0x18] sm:$0xff] }
 0x24e   : > { %1777 = vmatprep.subr.bf16.mxu1 %v3632_v62 }
 0x251   : > { %1778 = vmatpush1.bf16.msra.mxu1 %v3630_v63 }
 0x252   : > { %1779 = vmatprep.subr.bf16.mxu1 %v3641_v0 }
 0x255   : > { %1780 = vmatpush1.bf16.msra.mxu1 %v3639_v1 }
 0x2db   : > { %v1178_v9 = vpop.f32.mrb[0].mxu1 }
 0x2dc   : > { %v1179_v10 = vadd.f32 %v1178_v9, %v4700_v7  ;;  %v1180_v11 = vpop.f32.mrb[1].mxu1 }
 0x2dd   : > { %v1181_v12 = vadd.f32 %v1180_v11, %v4704_v8  ;;  %v1182_v13 = vpop.f32.mrb[2].mxu1 }
 0x2de   : > { %2249 = vst [vmem:[%s4709_s19] sm:$0xff] %v1179_v10  ;;  %v1183_v14 = vadd.f32 %v1182_v13, %v4700_v7  ;;  %v1184_v15 = vpop.f32.mrb[3].mxu1 }
 0x2df   : > { %v1257_v17 = vmul.f32 0.5, %v1181_v12  ;;  %2265 = vst [vmem:[%s4714_s14] sm:$0xff] %v1181_v12  ;;  %v1185_v18 = vadd.f32 %v1184_v15, %v4704_v8 }
 0x2e0   : > { %2250 = vst [vmem:[%s4709_s19 + $0x8] sm:$0xff] %v1183_v14 }
 0x2e1   : > { %v1273_v19 = vmul.f32 1.442695, %v1257_v17  ;;  %v1258_v20 = vmul.f32 0.5, %v1185_v18  ;;  %2266 = vst [vmem:[%s4714_s14 + $0x8] sm:$0xff] %v1185_v18 }
 0x2e3   : > { %3657 = vpow2.f32 %v1273_v19  ;;  %v1275_v21 = vmul.f32 1.442695, %v1258_v20  ;;  %v1188_v23 = vpop.f32.mrb[4].mxu1  ;;  %v1309_v19 = vld [vmem:[%s4610_s23 + $0x20] sm:$0xff]  ;;  %v4775_v20 = vld [vmem:[#allocation13 + $0x8] ss:$16 sps:$4 sm:$0xff]  }
 0x2e4   : > { %v4721_v24 = vadd.f32 %v1188_v23, %v4700_v7  ;;  %v1190_v25 = vpop.f32.mrb[5].mxu1 }
 0x2e5   : > { %3659 = vpow2.f32 %v1275_v21  ;;  %v1191_v26 = vadd.f32 %v1190_v25, %v4704_v8  ;;  %v1192_v27 = vpop.f32.mrb[6].mxu1  ;;  %v4781_v25 = vld [vmem:[#allocation13 + $0x2c] ss:$16 sps:$4 sm:$0xff]  }
 0x2e6   : > { %2251 = vst [vmem:[%s4709_s19 + $0x10] sm:$0xff] %v4721_v24  ;;  %v4727_v28 = vadd.f32 %v1192_v27, %v4700_v7  ;;  %v1194_v29 = vpop.f32.mrb[7].mxu1 }
 0x2e7   : > { %v1259_v30 = vmul.f32 0.5, %v1191_v26  ;;  %2267 = vst [vmem:[%s4714_s14 + $0x10] sm:$0xff] %v1191_v26  ;;  %v1195_v31 = vadd.f32 %v1194_v29, %v4704_v8  ;;  %v1310_v29 = vld [vmem:[%s4610_s23 + $0x28] sm:$0xff] }
 0x2e8   : > { %2252 = vst [vmem:[%s4709_s19 + $0x18] sm:$0xff] %v4727_v28 }
 0x2e9   : > { %v1277_v32 = vmul.f32 1.442695, %v1259_v30  ;;  %v1260_v33 = vmul.f32 0.5, %v1195_v31  ;;  %2268 = vst [vmem:[%s4714_s14 + $0x18] sm:$0xff] %v1195_v31 }
 0x2eb   : > { %3661 = vpow2.f32 %v1277_v32  ;;  %v1279_v34 = vmul.f32 1.442695, %v1260_v33  ;;  %v1198_v35 = vpop.f32.mrb[8].mxu1 }
 0x2ec   : > { %v4736_v37 = vadd.f32 %v1198_v35, %v4700_v7  ;;  %v1200_v38 = vpop.f32.mrb[9].mxu1 }
 0x2ed   : > { %v3658_v39 = vpop.eup %3657  ;;  %3663 = vpow2.f32 %v1279_v34  ;;  %v1201_v40 = vadd.f32 %v1200_v38, %v4704_v8  ;;  %v1202_v41 = vpop.f32.mrb[10].mxu1 }
 0x2ee   : > { %2253 = vst [vmem:[%s4709_s19 + $0x20] sm:$0xff] %v4736_v37  ;;  %v4743_v43 = vadd.f32 %v1202_v41, %v4700_v7  ;;  %v1204_v44 = vpop.f32.mrb[11].mxu1  ;;  %v1321_v45 = vmul.f32 %v3658_v39, %v1305_v36  ;;  %v4793_v36 = vld [vmem:[#allocation13 + $0x28] ss:$16 sps:$4 sm:$0xff]  }
 0x2ef   : > { %v3660_v46 = vpop.eup %3659  ;;  %v1261_v47 = vmul.f32 0.5, %v1201_v40  ;;  %2269 = vst [vmem:[%s4714_s14 + $0x20] sm:$0xff] %v1201_v40  ;;  %v1205_v48 = vadd.f32 %v1204_v44, %v4704_v8  ;;  %v4799_v40 = vld [vmem:[#allocation13 + $0x4c] ss:$16 sps:$4 sm:$0xff]  }
 0x2f0   : > { %2254 = vst [vmem:[%s4709_s19 + $0x28] sm:$0xff] %v4743_v43  ;;  %v1322_v49 = vmul.f32 %v3660_v46, %v1306_v42  ;;  %v1337_v50 = vadd.f32 %v1321_v45, %v1179_v10 }
 0x2f1   : > { %v1281_v51 = vmul.f32 1.442695, %v1261_v47  ;;  %v1262_v52 = vmul.f32 0.5, %v1205_v48  ;;  %2270 = vst [vmem:[%s4714_s14 + $0x28] sm:$0xff] %v1205_v48  ;;  %v1311_v47 = vld [vmem:[%s4610_s23 + $0x30] sm:$0xff] }
 0x2f2   : > { %v1338_v22 = vadd.f32 %v1322_v49, %v1183_v14  ;;  %2281 = vst [vmem:[%s4751_s28] sm:$0xff] %v1337_v50 }
 0x2f3   : > { %3665 = vpow2.f32 %v1281_v51  ;;  %v1283_v54 = vmul.f32 1.442695, %v1262_v52  ;;  %v1208_v56 = vpop.f32.mrb[12].mxu1 }
 0x2f4   : > { %v4756_v57 = vadd.f32 %v1208_v56, %v4700_v7  ;;  %v1210_v58 = vpop.f32.mrb[13].mxu1  ;;  %v1353_v59 = vpack.c.bf16 %v1338_v22, %v1337_v50  ;;  %2282 = vst [vmem:[%s4751_s28 + $0x8] sm:$0xff] %v1338_v22 }
 0x2f5   : > { %v3662_v60 = vpop.eup %3661  ;;  %3667 = vpow2.f32 %v1283_v54  ;;  %v1211_v62 = vadd.f32 %v1210_v58, %v4704_v8  ;;  %v1212_v63 = vpop.f32.mrb[14].mxu1 }
 0x2f6   : > { %v1323_v0 = vmul.f32 %v3662_v60, %v1307_v53  ;;  %2255 = vst [vmem:[%s4709_s19 + $0x30] sm:$0xff] %v4756_v57  ;;  %v4764_v1 = vadd.f32 %v1212_v63, %v4700_v7  ;;  %v1214_v2 = vpop.f32.mrb[15].mxu1  ;;  %3398 = vmatprep.mubr.bf16.mxu0 %v1353_v59  ;;  %v1312_v53 = vld [vmem:[%s4610_s23 + $0x38] sm:$0xff] }
 0x2f7   : > { %v3664_v5 = vpop.eup %3663  ;;  %v1263_v9 = vmul.f32 0.5, %v1211_v62  ;;  %2271 = vst [vmem:[%s4714_s14 + $0x30] sm:$0xff] %v1211_v62  ;;  %v1215_v10 = vadd.f32 %v1214_v2, %v4704_v8  ;;  %v4825_v62 = vld [vmem:[#allocation13 + $0x68] ss:$16 sps:$4 sm:$0xff]   ;;  %v4831_v2 = vld [vmem:[#allocation13 + $0x8c] ss:$16 sps:$4 sm:$0xff]  }
 0x2f8   : > { %v1324_v11 = vmul.f32 %v3664_v5, %v1308_v61  ;;  %2256 = vst [vmem:[%s4709_s19 + $0x38] sm:$0xff] %v4764_v1  ;;  %v1339_v12 = vadd.f32 %v1323_v0, %v4721_v24 }
 0x2f9   : > { %v1285_v13 = vmul.f32 1.442695, %v1263_v9  ;;  %v1264_v14 = vmul.f32 0.5, %v1215_v10  ;;  %2272 = vst [vmem:[%s4714_s14 + $0x38] sm:$0xff] %v1215_v10 }
 0x2fa   : > { %v1340_v15 = vadd.f32 %v1324_v11, %v4727_v28  ;;  %2283 = vst [vmem:[%s4751_s28 + $0x10] sm:$0xff] %v1339_v12 }
 0x2fb   : > { %3669 = vpow2.f32 %v1285_v13  ;;  %v1287_v17 = vmul.f32 1.442695, %v1264_v14  ;;  %v1218_v18 = vpop.f32.mrb[16].mxu1  ;;  %v1313_v13 = vld [vmem:[%s4610_s23 + $0x40] sm:$0xff] }
 0x2fc   : > { %v4778_v21 = vadd.f32 %v1218_v18, %v4700_v7  ;;  %v1220_v23 = vpop.f32.mrb[17].mxu1  ;;  %v1354_v24 = vpack.c.bf16 %v1340_v15, %v1339_v12  ;;  %2284 = vst [vmem:[%s4751_s28 + $0x18] sm:$0xff] %v1340_v15 }
 0x2fd   : > { %v3666_v26 = vpop.eup %3665  ;;  %3671 = vpow2.f32 %v1287_v17  ;;  %v1221_v27 = vadd.f32 %v1220_v23, %v4704_v8  ;;  %v1222_v28 = vpop.f32.mrb[18].mxu1 }
 0x2fe   : > { %2257 = vst [vmem:[%s4709_s19 + $0x40] sm:$0xff] %v4778_v21  ;;  %v4788_v30 = vadd.f32 %v1222_v28, %v4700_v7  ;;  %v1224_v31 = vpop.f32.mrb[19].mxu1  ;;  %3399 = vmatmul.mubr.bf16.vlgmr.msra.gmra.mrb[32].mxu0 %v1354_v24  ;;  %v1325_v32 = vmul.f32 %v3666_v26, %v1309_v19  ;;  %v1314_v24 = vld [vmem:[%s4610_s23 + $0x48] sm:$0xff] }
 0x2ff   : > { %v3668_v33 = vpop.eup %3667  ;;  %v1265_v34 = vmul.f32 0.5, %v1221_v27  ;;  %2273 = vst [vmem:[%s4714_s14 + $0x40] sm:$0xff] %v1221_v27  ;;  %v1225_v35 = vadd.f32 %v1224_v31, %v4704_v8  ;;  %1881 = vmatpush1.bf16.msra.mxu0 %v4775_v20 }
 0x300   : > { %2258 = vst [vmem:[%s4709_s19 + $0x48] sm:$0xff] %v4788_v30  ;;  %v1326_v38 = vmul.f32 %v3668_v33, %v1310_v29  ;;  %v1341_v39 = vadd.f32 %v1325_v32, %v4736_v37  ;;  %1882 = vmatprep.subr.bf16.mxu0 %v4781_v25  ;;  %v4806_v37 = vld [vmem:[#allocation13 + $0x48] ss:$16 sps:$4 sm:$0xff]  }
 0x301   : > { %v1289_v41 = vmul.f32 1.442695, %v1265_v34  ;;  %v1266_v42 = vmul.f32 0.5, %v1225_v35  ;;  %2274 = vst [vmem:[%s4714_s14 + $0x48] sm:$0xff] %v1225_v35  ;;  %v4857_v33 = vld [vmem:[#allocation13 + $0xa8] ss:$16 sps:$4 sm:$0xff]  }
 0x302   : > { %v1342_v44 = vadd.f32 %v1326_v38, %v4743_v43  ;;  %2285 = vst [vmem:[%s4751_s28 + $0x20] sm:$0xff] %v1341_v39  ;;  %v4813_v43 = vld [vmem:[#allocation13 + $0x6c] ss:$16 sps:$4 sm:$0xff]  }
 0x303   : > { %3673 = vpow2.f32 %v1289_v41  ;;  %v1291_v45 = vmul.f32 1.442695, %v1266_v42  ;;  %v1228_v46 = vpop.f32.mrb[20].mxu1  ;;  %1883 = vmatpush1.bf16.msra.mxu0 %v4793_v36 }
 0x304   : > { %v4809_v48 = vadd.f32 %v1228_v46, %v4700_v7  ;;  %v1230_v49 = vpop.f32.mrb[21].mxu1  ;;  %v1355_v50 = vpack.c.bf16 %v1342_v44, %v1341_v39  ;;  %2286 = vst [vmem:[%s4751_s28 + $0x28] sm:$0xff] %v1342_v44  ;;  %1884 = vmatprep.subr.bf16.mxu0 %v4799_v40 }
 0x305   : > { %v3670_v51 = vpop.eup %3669  ;;  %3675 = vpow2.f32 %v1291_v45  ;;  %v1231_v52 = vadd.f32 %v1230_v49, %v4704_v8  ;;  %v1232_v22 = vpop.f32.mrb[22].mxu1  ;;  %v1315_v45 = vld [vmem:[%s4610_s23 + $0x50] sm:$0xff] }
 0x306   : > { %2259 = vst [vmem:[%s4709_s19 + $0x50] sm:$0xff] %v4809_v48  ;;  %v4820_v54 = vadd.f32 %v1232_v22, %v4700_v7  ;;  %v1234_v56 = vpop.f32.mrb[23].mxu1  ;;  %3402 = vmatprep.mubr.bf16.mxu0 %v1355_v50  ;;  %v1327_v58 = vmul.f32 %v3670_v51, %v1311_v47  ;;  %v1316_v51 = vld [vmem:[%s4610_s23 + $0x58] sm:$0xff] }
 0x307   : > { %v3672_v59 = vpop.eup %3671  ;;  %v1267_v60 = vmul.f32 0.5, %v1231_v52  ;;  %2275 = vst [vmem:[%s4714_s14 + $0x50] sm:$0xff] %v1231_v52  ;;  %v1235_v61 = vadd.f32 %v1234_v56, %v4704_v8  ;;  %1885 = vmatpush1.bf16.msra.mxu0 %v4806_v37 }
 0x308   : > { %2260 = vst [vmem:[%s4709_s19 + $0x58] sm:$0xff] %v4820_v54  ;;  %v1328_v63 = vmul.f32 %v3672_v59, %v1312_v53  ;;  %v1343_v0 = vadd.f32 %v1327_v58, %v4756_v57  ;;  %1886 = vmatprep.subr.bf16.mxu0 %v4813_v43  ;;  %v4838_v57 = vld [vmem:[#allocation13 + $0x88] ss:$16 sps:$4 sm:$0xff]  }
 0x309   : > { %v1293_v5 = vmul.f32 1.442695, %v1267_v60  ;;  %v1268_v9 = vmul.f32 0.5, %v1235_v61  ;;  %2276 = vst [vmem:[%s4714_s14 + $0x58] sm:$0xff] %v1235_v61 }
 0x30a   : > { %v1344_v10 = vadd.f32 %v1328_v63, %v4764_v1  ;;  %2287 = vst [vmem:[%s4751_s28 + $0x30] sm:$0xff] %v1343_v0  ;;  %v4845_v1 = vld [vmem:[#allocation13 + $0xac] ss:$16 sps:$4 sm:$0xff]  }
 0x30b   : > { %3677 = vpow2.f32 %v1293_v5  ;;  %v1295_v11 = vmul.f32 1.442695, %v1268_v9  ;;  %v1238_v12 = vpop.f32.mrb[24].mxu1  ;;  %1887 = vmatpush1.bf16.msra.mxu0 %v4825_v62  ;;  %v1317_v9 = vld [vmem:[%s4610_s23 + $0x60] sm:$0xff] }
 0x30c   : > { %v4841_v14 = vadd.f32 %v1238_v12, %v4700_v7  ;;  %v1240_v15 = vpop.f32.mrb[25].mxu1  ;;  %v1356_v17 = vpack.c.bf16 %v1344_v10, %v1343_v0  ;;  %2288 = vst [vmem:[%s4751_s28 + $0x38] sm:$0xff] %v1344_v10  ;;  %1888 = vmatprep.subr.bf16.mxu0 %v4831_v2 }
 0x30d   : > { %v3674_v18 = vpop.eup %3673  ;;  %3679 = vpow2.f32 %v1295_v11  ;;  %v1241_v19 = vadd.f32 %v1240_v15, %v4704_v8  ;;  %v1242_v23 = vpop.f32.mrb[26].mxu1  ;;  %v1318_v11 = vld [vmem:[%s4610_s23 + $0x68] sm:$0xff] }
 0x30e   : > { %2261 = vst [vmem:[%s4709_s19 + $0x60] sm:$0xff] %v4841_v14  ;;  %v4852_v26 = vadd.f32 %v1242_v23, %v4700_v7  ;;  %v1244_v27 = vpop.f32.mrb[27].mxu1  ;;  %3403 = vmatmul.mubr.bf16.gmra.mrb[36].mxu0 %v1356_v17  ;;  %v1329_v28 = vmul.f32 %v3674_v18, %v1313_v13  ;;  %v1319_v17 = vld [vmem:[%s4610_s23 + $0x70] sm:$0xff]  ;;  %v1320_v23 = vld [vmem:[%s4610_s23 + $0x78] sm:$0xff]  ;;  %s2639_s23 = scalar_lea.sflag [#allocation16], %s4603_s29 }
 0x30f   : > { %v3676_v29 = vpop.eup %3675  ;;  %v1269_v31 = vmul.f32 0.5, %v1241_v19  ;;  %2277 = vst [vmem:[%s4714_s14 + $0x60] sm:$0xff] %v1241_v19  ;;  %v1245_v32 = vadd.f32 %v1244_v27, %v4704_v8  ;;  %1889 = vmatpush1.bf16.msra.mxu0 %v4838_v57 }
 0x310   : > { %2262 = vst [vmem:[%s4709_s19 + $0x68] sm:$0xff] %v4852_v26  ;;  %v1330_v34 = vmul.f32 %v3676_v29, %v1314_v24  ;;  %v1345_v35 = vadd.f32 %v1329_v28, %v4778_v21  ;;  %1890 = vmatprep.subr.bf16.mxu0 %v4845_v1 }
 0x311   : > { %v1297_v38 = vmul.f32 1.442695, %v1269_v31  ;;  %v1270_v39 = vmul.f32 0.5, %v1245_v32  ;;  %2278 = vst [vmem:[%s4714_s14 + $0x68] sm:$0xff] %v1245_v32 }
 0x312   : > { %v1346_v41 = vadd.f32 %v1330_v34, %v4788_v30  ;;  %2289 = vst [vmem:[%s4751_s28 + $0x40] sm:$0xff] %v1345_v35  ;;  %v3648_v34 = vld [vmem:[#allocation13 + $0xe0] ss:$16 sps:$4 sm:$0xff]  }
 0x313   : > { %3681 = vpow2.f32 %v1297_v38  ;;  %v1299_v42 = vmul.f32 1.442695, %v1270_v39  ;;  %v1248_v44 = vpop.f32.mrb[28].mxu1  ;;  %1891 = vmatpush1.bf16.msra.mxu0 %v4857_v33  ;;  %v4899_v38 = vld [vmem:[#allocation13 + $0xec] ss:$16 sps:$4 sm:$0xff]  }
 0x314   : > { %v1249_v46 = vadd.f32 %v1248_v44, %v4700_v7  ;;  %v1250_v21 = vpop.f32.mrb[29].mxu1  ;;  %v1357_v47 = vpack.c.bf16 %v1346_v41, %v1345_v35  ;;  %2290 = vst [vmem:[%s4751_s28 + $0x48] sm:$0xff] %v1346_v41  ;;  %v3650_v35 = vld [vmem:[#allocation13 + $0xe4] ss:$16 sps:$4 sm:$0xff]   ;;  %v4901_v39 = vld [vmem:[#allocation13 + $0xe8] ss:$16 sps:$4 sm:$0xff]  }
 0x315   : > { %v3678_v49 = vpop.eup %3677  ;;  %3683 = vpow2.f32 %v1299_v42  ;;  %v1251_v50 = vadd.f32 %v1250_v21, %v4704_v8  ;;  %v1252_v30 = vpop.f32.mrb[30].mxu1  ;;  %1781 = vmatprep.subr.bf16.mxu1 %v3650_v35  ;;  %v4909_v41 = vld [vmem:[%s5628_s8] ss:$0 sm:$0xff] }
 0x316   : > { %2263 = vst [vmem:[%s4709_s19 + $0x70] sm:$0xff] %v1249_v46  ;;  %v1253_v52 = vadd.f32 %v1252_v30, %v4700_v7  ;;  %v1254_v22 = vpop.f32.mrb[31].mxu1  ;;  %3406 = vmatprep.mubr.bf16.mxu0 %v1357_v47  ;;  %v1331_v53 = vmul.f32 %v3678_v49, %v1315_v45  ;;  %1782 = vmatpush1.bf16.msra.mxu1 %v3648_v34 }
 0x317   : > { %v3680_v56 = vpop.eup %3679  ;;  %v1271_v58 = vmul.f32 0.5, %v1251_v50  ;;  %2279 = vst [vmem:[%s4714_s14 + $0x70] sm:$0xff] %v1251_v50  ;;  %v1255_v59 = vadd.f32 %v1254_v22, %v4704_v8  ;;  %3414 = vmatprep.subr.bf16.mxu1 %v4688_v55 }
 0x318   : > { %2264 = vst [vmem:[%s4709_s19 + $0x78] sm:$0xff] %v1253_v52  ;;  %v1332_v60 = vmul.f32 %v3680_v56, %v1316_v51  ;;  %v1347_v61 = vadd.f32 %v1331_v53, %v4809_v48 }
 0x319   : > { %v1301_v63 = vmul.f32 1.442695, %v1271_v58  ;;  %v1272_v0 = vmul.f32 0.5, %v1255_v59  ;;  %2280 = vst [vmem:[%s4714_s14 + $0x78] sm:$0xff] %v1255_v59 }
 0x31a   : > { %v1348_v7 = vadd.f32 %v1332_v60, %v4820_v54  ;;  %2291 = vst [vmem:[%s4751_s28 + $0x50] sm:$0xff] %v1347_v61 }
 0x31b   : > { %3685 = vpow2.f32 %v1301_v63  ;;  %v1303_v5 = vmul.f32 1.442695, %v1272_v0 }
 0x31c   : > { %v1358_v10 = vpack.c.bf16 %v1348_v7, %v1347_v61  ;;  %2292 = vst [vmem:[%s4751_s28 + $0x58] sm:$0xff] %v1348_v7 }
 0x31d   : > { %v3682_v8 = vpop.eup %3681  ;;  %3687 = vpow2.f32 %v1303_v5 }
 0x31e   : > { %3407 = vmatmul.mubr.bf16.gmra.mrb[40].mxu0 %v1358_v10  ;;  %v1333_v48 = vmul.f32 %v3682_v8, %v1317_v9 }
 0x31f   : > { %v3684_v12 = vpop.eup %3683 }
 0x320   : > { %v1334_v13 = vmul.f32 %v3684_v12, %v1318_v11  ;;  %v1349_v54 = vadd.f32 %v1333_v48, %v4841_v14  ;;  %v4893_v14 = vld [vmem:[#allocation13 + $0xcc] ss:$16 sps:$4 sm:$0xff]  }
 0x321   : > { %1892 = vmatprep.subr.bf16.mxu0 %v4893_v14 }
 0x322   : > { %v1350_v15 = vadd.f32 %v1334_v13, %v4852_v26  ;;  %2293 = vst [vmem:[%s4751_s28 + $0x60] sm:$0xff] %v1349_v54  ;;  %v4895_v26 = vld [vmem:[#allocation13 + $0xc8] ss:$16 sps:$4 sm:$0xff]  }
 0x323   : > { %1893 = vmatpush1.bf16.msra.mxu0 %v4895_v26 }
 0x324   : > { %v1359_v18 = vpack.c.bf16 %v1350_v15, %v1349_v54  ;;  %2294 = vst [vmem:[%s4751_s28 + $0x68] sm:$0xff] %v1350_v15  ;;  %1894 = vmatprep.subr.bf16.mxu0 %v4899_v38 }
 0x325   : > { %v3686_v19 = vpop.eup %3685 }
 0x326   : > { %3410 = vmatprep.mubr.bf16.mxu0 %v1359_v18  ;;  %v1335_v24 = vmul.f32 %v3686_v19, %v1319_v17 }
 0x327   : > { %v3688_v27 = vpop.eup %3687  ;;  %1895 = vmatpush1.bf16.msra.mxu0 %v4901_v39 }
 0x328   : > { %v1336_v28 = vmul.f32 %v3688_v27, %v1320_v23  ;;  %v1351_v29 = vadd.f32 %v1335_v24, %v1249_v46 }
 0x32a   : > { %v1352_v31 = vadd.f32 %v1336_v28, %v1253_v52  ;;  %2295 = vst [vmem:[%s4751_s28 + $0x70] sm:$0xff] %v1351_v29 }
 0x32c   : > { %v1360_v32 = vpack.c.bf16 %v1352_v31, %v1351_v29  ;;  %2296 = vst [vmem:[%s4751_s28 + $0x78] sm:$0xff] %v1352_v31 }
 0x32e   : > { %3411 = vmatmul.mubr.bf16.gmra.mrb[44].mxu0 %v1360_v32 }
 0x32f   : > { %1912 = vmatprep.mubr.bf16.mxu0 %v4200_v16 }
 0x3d1   : > { %v3400_v42 = vpop.f32.mrb[32].mxu0 }
 0x3d2   : > { %v1475_v44 = vadd.f32 %v3400_v42, %v4909_v41  ;;  %v1466_v45 = vpop.f32.mrb[33].mxu0 }
 0x3d3   : > { %v1467_v46 = vadd.f32 %v4909_v41, %v1466_v45  ;;  %v3401_v21 = vpop.f32.mrb[34].mxu0 }
 0x3d4   : > { %v1478_v47 = vadd.f32 %v3401_v21, %v4909_v41  ;;  %v1469_v49 = vpop.f32.mrb[35].mxu0  ;;  %v1531_v30 = vmax.f32 %v1475_v44, 0.0 }
 0x3d5   : > { %v1470_v50 = vadd.f32 %v4909_v41, %v1469_v49  ;;  %v1529_v55 = vmax.f32 %v1467_v46, 0.0 }
 0x3d6   : > { %v1532_v51 = vmax.f32 %v1478_v47, 0.0 }
 0x3d7   : > { %v1530_v52 = vmax.f32 %v1470_v50, 0.0 }
 0x3d8   : > { %v1546_v22 = vpack.c.bf16 %v1532_v51, %v1531_v30 }
 0x3d9   : > { %v1545_v53 = vpack.c.bf16 %v1530_v52, %v1529_v55 }
 0x3db   : > { %1800 = vmatmul.mubr.bf16.vlgmr.msra.gmra.mrb[32].mxu1 %v1545_v53  ;;  %1913 = vmatmul.mubr.bf16.vlgmr.msra.gmra.mrb[48].mxu0 %v1545_v53 }
 0x3dc   : > { %3422 = vmatpush1.bf16.msra.mxu1 %v4775_v20  ;;  %1809 = vmatprep.mubr.bf16.mxu1 %v4200_v16 }
 0x3dd   : > { %3415 = vmatprep.subr.bf16.mxu1 %v4781_v25  ;;  %1922 = vmatprep.mubr.bf16.mxu0 %v4200_v16 }
 0x3e0   : > { %3423 = vmatpush1.bf16.msra.mxu1 %v4793_v36 }
 0x3e1   : > { %v3404_v56 = vpop.f32.mrb[36].mxu0  ;;  %3416 = vmatprep.subr.bf16.mxu1 %v4799_v40 }
 0x3e2   : > { %v1491_v58 = vadd.f32 %v3404_v56, %v4909_v41  ;;  %v1482_v59 = vpop.f32.mrb[37].mxu0 }
 0x3e3   : > { %v1483_v60 = vadd.f32 %v4909_v41, %v1482_v59  ;;  %v3405_v61 = vpop.f32.mrb[38].mxu0  ;;  %1810 = vmatmul.mubr.bf16.gmra.mrb[36].mxu1 %v1546_v22  ;;  %1923 = vmatmul.mubr.bf16.gmra.mrb[52].mxu0 %v1546_v22 }
 0x3e4   : > { %v1494_v20 = vadd.f32 %v3405_v61, %v4909_v41  ;;  %v1485_v63 = vpop.f32.mrb[39].mxu0  ;;  %1819 = vmatprep.mubr.bf16.mxu1 %v4200_v16  ;;  %1932 = vmatprep.mubr.bf16.mxu0 %v4200_v16  ;;  %v1535_v36 = vmax.f32 %v1491_v58, 0.0 }
 0x3e5   : > { %v1486_v25 = vadd.f32 %v4909_v41, %v1485_v63  ;;  %3424 = vmatpush1.bf16.msra.mxu1 %v4806_v37  ;;  %v1533_v0 = vmax.f32 %v1483_v60, 0.0 }
 0x3e6   : > { %v1536_v40 = vmax.f32 %v1494_v20, 0.0  ;;  %3417 = vmatprep.subr.bf16.mxu1 %v4813_v43 }
 0x3e7   : > { %v1534_v7 = vmax.f32 %v1486_v25, 0.0 }
 0x3e8   : > { %v1548_v5 = vpack.c.bf16 %v1536_v40, %v1535_v36 }
 0x3e9   : > { %v1547_v9 = vpack.c.bf16 %v1534_v7, %v1533_v0  ;;  %3425 = vmatpush1.bf16.msra.mxu1 %v4825_v62 }
 0x3ea   : > { %3418 = vmatprep.subr.bf16.mxu1 %v4831_v2 }
 0x3eb   : > { %1820 = vmatmul.mubr.bf16.gmra.mrb[40].mxu1 %v1547_v9  ;;  %1933 = vmatmul.mubr.bf16.gmra.mrb[56].mxu0 %v1547_v9 }
 0x3ec   : > { %1829 = vmatprep.mubr.bf16.mxu1 %v4200_v16  ;;  %1942 = vmatprep.mubr.bf16.mxu0 %v4200_v16 }
 0x3ed   : > { %3426 = vmatpush1.bf16.msra.mxu1 %v4838_v57 }
 0x3ee   : > { %3419 = vmatprep.subr.bf16.mxu1 %v4845_v1 }
 0x3f1   : > { %v3408_v37 = vpop.f32.mrb[40].mxu0  ;;  %3427 = vmatpush1.bf16.msra.mxu1 %v4857_v33 }
 0x3f2   : > { %v1507_v43 = vadd.f32 %v3408_v37, %v4909_v41  ;;  %v1498_v10 = vpop.f32.mrb[41].mxu0  ;;  %3420 = vmatprep.subr.bf16.mxu1 %v4893_v14 }
 0x3f3   : > { %v1499_v62 = vadd.f32 %v4909_v41, %v1498_v10  ;;  %v3409_v2 = vpop.f32.mrb[42].mxu0  ;;  %1830 = vmatmul.mubr.bf16.gmra.mrb[44].mxu1 %v1548_v5  ;;  %1943 = vmatmul.mubr.bf16.gmra.mrb[60].mxu0 %v1548_v5 }
 0x3f4   : > { %v1510_v8 = vadd.f32 %v3409_v2, %v4909_v41  ;;  %v1501_v11 = vpop.f32.mrb[43].mxu0  ;;  %1839 = vmatprep.mubr.bf16.mxu1 %v4200_v16  ;;  %1952 = vmatprep.mubr.bf16.mxu0 %v4200_v16  ;;  %v1539_v1 = vmax.f32 %v1507_v43, 0.0 }
 0x3f5   : > { %v1502_v57 = vadd.f32 %v4909_v41, %v1501_v11  ;;  %3428 = vmatpush1.bf16.msra.mxu1 %v4895_v26  ;;  %v1537_v48 = vmax.f32 %v1499_v62, 0.0 }
 0x3f6   : > { %v1540_v33 = vmax.f32 %v1510_v8, 0.0  ;;  %3421 = vmatprep.subr.bf16.mxu1 %v4899_v38 }
 0x3f7   : > { %v1538_v12 = vmax.f32 %v1502_v57, 0.0 }
 0x3f8   : > { %v1550_v13 = vpack.c.bf16 %v1540_v33, %v1539_v1 }
 0x3f9   : > { %v1549_v54 = vpack.c.bf16 %v1538_v12, %v1537_v48  ;;  %3429 = vmatpush1.bf16.msra.mxu1 %v4901_v39 }
 0x3fb   : > { %1840 = vmatmul.mubr.bf16.gmra.mrb[48].mxu1 %v1549_v54  ;;  %1953 = vmatmul.mubr.bf16.gmra.mrb[64].mxu0 %v1549_v54 }
 0x3fc   : > { %1849 = vmatprep.mubr.bf16.mxu1 %v4200_v16  ;;  %1962 = vmatprep.mubr.bf16.mxu0 %v4200_v16 }
 0x401   : > { %v3412_v15 = vpop.f32.mrb[44].mxu0 }
 0x402   : > { %v1523_v17 = vadd.f32 %v3412_v15, %v4909_v41  ;;  %v1514_v18 = vpop.f32.mrb[45].mxu0 }
 0x403   : > { %v1515_v19 = vadd.f32 %v4909_v41, %v1514_v18  ;;  %v3413_v23 = vpop.f32.mrb[46].mxu0  ;;  %1850 = vmatmul.mubr.bf16.gmra.mrb[52].mxu1 %v1550_v13  ;;  %1963 = vmatmul.mubr.bf16.gmra.mrb[68].mxu0 %v1550_v13 }
 0x404   : > { %v1526_v24 = vadd.f32 %v3413_v23, %v4909_v41  ;;  %v1517_v27 = vpop.f32.mrb[47].mxu0  ;;  %1859 = vmatprep.mubr.bf16.mxu1 %v4200_v16  ;;  %v1543_v29 = vmax.f32 %v1523_v17, 0.0 }
 0x405   : > { %v1518_v28 = vadd.f32 %v4909_v41, %v1517_v27  ;;  %v1541_v32 = vmax.f32 %v1515_v19, 0.0 }
 0x406   : > { %v1544_v31 = vmax.f32 %v1526_v24, 0.0 }
 0x407   : > { %v1542_v14 = vmax.f32 %v1518_v28, 0.0 }
 0x408   : > { %v1552_v26 = vpack.c.bf16 %v1544_v31, %v1543_v29 }
 0x409   : > { %v1551_v34 = vpack.c.bf16 %v1542_v14, %v1541_v32 }
 0x40b   : > { %1860 = vmatmul.mubr.bf16.gmra.mrb[56].mxu1 %v1551_v34 }
 0x40c   : > { %1869 = vmatprep.mubr.bf16.mxu1 %v4200_v16 }
 0x413   : > { %1870 = vmatmul.mubr.bf16.gmra.mrb[60].mxu1 %v1552_v26 }
 0x414   : > { %1972 = vmatprep.mubr.bf16.mxu1 %v4200_v16 }
 0x41b   : > { %1973 = vmatmul.mubr.bf16.vlgmr.msra.gmra.mrb[64].mxu1 %v1551_v34 }
 0x41c   : > { %1982 = vmatprep.mubr.bf16.mxu1 %v4200_v16 }
 0x423   : > { %1983 = vmatmul.mubr.bf16.gmra.mrb[68].mxu1 %v1552_v26 }
 0x424   : > { %3968 = shalt.err (!%p3965_p12)
}
 0x425   : > { %s3969_s21 = scalar_lea.hbm %s4963_s17, 2048  ;;  %s3973_s18 = scalar_lea.hbm %s5712_s1, 4096 }
 0x426   : > { %p3970_p8 = scmp.ne.s32.totalorder %s4963_s17, %s3969_s21  ;;  %p3974_p2 = scmp.lt.u32.totalorder %s4963_s17, %s5712_s1 }
 0x427   : > { %p3975_p6 = scmp.lt.u32.totalorder %s3973_s18, %s3969_s21  ;;  %p3977_p5 = scmp.lt.u32.totalorder %s3969_s21, %s4963_s17 }
 0x428   : > { %p3971_p10 = pnand %p3970_p8, %p5713_p1 }
 0x429   : > { %p3976_p3 = por %p3975_p6, %p3974_p2 }
 0x42a   : > { %p3972_p11 = pneg %p3971_p10 }
 0x42b   : > { %p3978_p4 = por %p3977_p5, %p3976_p3 }
 0x42d   : > { %p3979_p0 = pnand %p3978_p4, %p3972_p11 }
 0x42f   : > { %3982 = shalt.err (!%p3979_p0)
}
 0x430   : > { %s4202_s27 = smov 128   ;;  %s4203_s25 = smov 8  }
 0x431   : > { %3453 = dma.vmem_to_hbm [thread:$0]  (%p5713_p1), %s4966_s15, 2048, %s4963_s17, %s2639_s23, %s4202_s27, %s4202_s27, %s4203_s25  }
 0x432   : > { %s5714_s21 = sld [smem:[#allocation45_spill]]  ;;  %s2672_s18 = sshll.u32 %s4709_s19, 4  ;;  %s5002_s18 = int_to_ptr.vmem [resolvable:$true] %s2672_s18 }
 0x433   : > { %s5716_s1 = sld [smem:[#allocation47_spill]]  ;;  %s2634_s4 = scalar_lea.sflag [#allocation4], %s4592_s0 }
 0x434   : > { %s3983_s5 = scalar_lea.vmem %s5002_s18, 2048  ;;  %s4204_s17 = smov [#allocation14]  }
 0x435   : > { %p3984_p13 = scmp.ne.s32.totalorder %s5002_s18, %s3983_s5  ;;  %s3987_s15 = sshll.u32 %s4204_s17, 4  ;;  %s3988_s15 = int_to_ptr.vmem [resolvable:$false] %s3987_s15 }
 0x436   : > { %s3989_s19 = scalar_lea.vmem %s3988_s15, 4096  ;;  %p3990_p12 = scmp.lt.s32.totalorder %s5002_s18, %s3988_s15 }
 0x437   : > { %p3985_p7 = pnand %p3984_p13, %p5713_p1  ;;  %p3991_p8 = scmp.lt.s32.totalorder %s3989_s19, %s3983_s5 }
 0x438   : > { %s5715_s14 = smov %s5714_s21  ;;  %s4999_s13 = scalar_lea.hbm %s5714_s21, %s4957_s7 }
 0x439   : > { %s5008_s2 = scalar_lea.hbm %s5716_s1, %s4957_s7  ;;  %p3986_p9 = pneg %p3985_p7 }
 0x43a   : > { %p3992_p10 = por %p3991_p8, %p3990_p12 }
 0x43c   : > { %p3993_p11 = pnand %p3992_p10, %p3986_p9 }
 0x43e   : > { %3996 = shalt.err (!%p3993_p11)
}
 0x43f   : > { %s3997_s10 = scalar_lea.hbm %s4999_s13, 2048  ;;  %s4001_s12 = scalar_lea.hbm %s5715_s14, 4096 }
 0x440   : > { %p3998_p2 = scmp.ne.s32.totalorder %s4999_s13, %s3997_s10  ;;  %p4002_p5 = scmp.lt.u32.totalorder %s4999_s13, %s5715_s14 }
 0x441   : > { %p4003_p4 = scmp.lt.u32.totalorder %s4001_s12, %s3997_s10  ;;  %p4005_p13 = scmp.lt.u32.totalorder %s3997_s10, %s4999_s13 }
 0x442   : > { %p3999_p6 = pnand %p3998_p2, %p5713_p1 }
 0x443   : > { %p4004_p0 = por %p4003_p4, %p4002_p5 }
 0x444   : > { %p4000_p3 = pneg %p3999_p6 }
 0x445   : > { %p4006_p7 = por %p4005_p13, %p4004_p0 }
 0x447   : > { %p4007_p9 = pnand %p4006_p7, %p4000_p3 }
 0x449   : > { %4010 = shalt.err (!%p4007_p9)
}
 0x44a   : > { %3452 = dma.vmem_to_hbm [thread:$0]  (%p5713_p1), %s5002_s18, 2048, %s4999_s13, %s2634_s4, %s4202_s27, %s4202_s27, %s4203_s25  }
 0x44b   : > { %s2704_s5 = sshll.u32 %s4751_s28, 4  ;;  %s4205_s19 = smov [#allocation17]   ;;  %s5038_s5 = int_to_ptr.vmem [resolvable:$true] %s2704_s5 }
 0x44c   : > { %s4011_s15 = scalar_lea.vmem %s5038_s5, 2048  ;;  %s4015_s10 = sshll.u32 %s4205_s19, 4  ;;  %s4016_s10 = int_to_ptr.vmem [resolvable:$false] %s4015_s10 }
 0x44d   : > { %p4012_p12 = scmp.ne.s32.totalorder %s5038_s5, %s4011_s15  ;;  %s4017_s3 = scalar_lea.vmem %s4016_s10, 4096 }
 0x44e   : > { %p4018_p11 = scmp.lt.s32.totalorder %s5038_s5, %s4016_s10  ;;  %p4019_p2 = scmp.lt.s32.totalorder %s4017_s3, %s4011_s15 }
 0x44f   : > { %p4013_p8 = pnand %p4012_p12, %p5713_p1 }
 0x450   : > { %p4020_p6 = por %p4019_p2, %p4018_p11 }
 0x451   : > { %p4014_p10 = pneg %p4013_p8 }
 0x453   : > { %p4021_p3 = pnand %p4020_p6, %p4014_p10 }
 0x455   : > { %4024 = shalt.err (!%p4021_p3)
}
 0x456   : > { %s4025_s4 = scalar_lea.hbm %s5008_s2, 2048  ;;  %s4029_s18 = scalar_lea.hbm %s5716_s1, 4096 }
 0x457   : > { %p4026_p5 = scmp.ne.s32.totalorder %s5008_s2, %s4025_s4  ;;  %p4030_p13 = scmp.lt.u32.totalorder %s5008_s2, %s5716_s1 }
 0x458   : > { %p4031_p7 = scmp.lt.u32.totalorder %s4029_s18, %s4025_s4  ;;  %p4033_p12 = scmp.lt.u32.totalorder %s4025_s4, %s5008_s2 }
 0x459   : > { %p4027_p4 = pnand %p4026_p5, %p5713_p1 }
 0x45a   : > { %p4032_p9 = por %p4031_p7, %p4030_p13 }
 0x45b   : > { %p4028_p0 = pneg %p4027_p4 }
 0x45c   : > { %p4034_p8 = por %p4033_p12, %p4032_p9 }
 0x45e   : > { %p4035_p10 = pnand %p4034_p8, %p4028_p0 }
 0x460   : > { %4038 = shalt.err (!%p4035_p10)
}
 0x461   : > { %3454 = dma.vmem_to_hbm [thread:$0]  (%p5713_p1), %s5038_s5, 2048, %s5008_s2, %s2639_s23, %s4202_s27, %s4202_s27, %s4203_s25   ;;  %v1597_v16 = vsub.s32 2, %v4691_v3  ;;  %v1601_v38 = vsub.s32 3, %v4691_v3 }
 0x462   : > { %s5717_s15 = sld [smem:[#allocation44_spill]]  ;;  %s5108_s2 = scalar_lea.vmem [#allocation18], %s4606_s30 }
 0x463   : > { %s5112_s23 = scalar_lea.vmem [#allocation20], %s4606_s30  ;;  %s5195_s5 = scalar_lea.vmem [#allocation21], %s4606_s30 }
 0x464   : > { %s2721_s30 = sshll.u32 %s5108_s2, 4  ;;  %s5718_s3 = sld [smem:[#allocation48_spill]]  ;;  %s5452_s30 = int_to_ptr.vmem [resolvable:$true] %s2721_s30 }
 0x465   : > { %s2649_s28 = scalar_lea.sflag [#allocation19], %s4603_s29  ;;  %s4039_s13 = scalar_lea.vmem %s5452_s30, 2048 }
 0x466   : > { %p4040_p11 = scmp.ne.s32.totalorder %s5452_s30, %s4039_s13  ;;  %s4206_s18 = smov [#allocation18]  }
 0x467   : > { %s4043_s21 = sshll.u32 %s4206_s18, 4  ;;  %s4044_s21 = int_to_ptr.vmem [resolvable:$false] %s4043_s21 }
 0x468   : > { %v1585_v35 = vld [vmem:[%s5717_s15] sm:$0xf]  ;;  %p4041_p2 = pnand %p4040_p11, %p5713_p1  ;;  %s4045_s12 = scalar_lea.vmem %s4044_s21, 4096 }
 0x469   : > { %v5073_v39 = vrot.slane %v1585_v35, %v1056_v4  ;;  %v5075_v41 = vrot.slane %v1585_v35, %v1597_v16  ;;  %v5079_v42 = vrot.slane %v1585_v35, %v1060_v6  ;;  %v5081_v44 = vrot.slane %v1585_v35, %v1601_v38  ;;  %p4046_p3 = scmp.lt.s32.totalorder %s5452_s30, %s4044_s21  ;;  %p4047_p5 = scmp.lt.s32.totalorder %s4045_s12, %s4039_s13 }
 0x46a   : > { %s5450_s4 = scalar_lea.hbm %s5718_s3, %s4957_s7  ;;  %p4042_p6 = pneg %p4041_p2 }
 0x46b   : > { %p4048_p4 = por %p4047_p5, %p4046_p3 }
 0x46d   : > { %p4049_p0 = pnand %p4048_p4, %p4042_p6 }
 0x4ae   : > { %v1801_v45 = vpop.f32.mrb[32].mxu1  ;;  %v1914_v46 = vpop.f32.mrb[48].mxu0 }
 0x4af   : > { %v5084_v21 = vadd.f32 %v1801_v45, %v5073_v39  ;;  %v1915_v47 = vadd.f32 %v1914_v46, %v5075_v41  ;;  %v1803_v49 = vpop.f32.mrb[33].mxu1  ;;  %v1916_v50 = vpop.f32.mrb[49].mxu0 }
 0x4b0   : > { %v5088_v4 = vadd.f32 %v1803_v49, %v5079_v42  ;;  %v1917_v30 = vadd.f32 %v1916_v50, %v5081_v44  ;;  %v1805_v51 = vpop.f32.mrb[34].mxu1  ;;  %v1918_v3 = vpop.f32.mrb[50].mxu0 }
 0x4b1   : > { %v1993_v6 = vmax.f32 %v5084_v21, 0.0  ;;  %v1995_v55 = vmax.f32 %v1915_v47, 0.0  ;;  %v5093_v52 = vadd.f32 %v1805_v51, %v5073_v39  ;;  %v1919_v22 = vadd.f32 %v1918_v3, %v5075_v41  ;;  %v1807_v53 = vpop.f32.mrb[35].mxu1  ;;  %v1920_v56 = vpop.f32.mrb[51].mxu0 }
 0x4b2   : > { %v1994_v58 = vmax.f32 %v5088_v4, 0.0  ;;  %v1996_v59 = vmax.f32 %v1917_v30, 0.0  ;;  %v5098_v60 = vadd.f32 %v1807_v53, %v5079_v42  ;;  %v1921_v61 = vadd.f32 %v1920_v56, %v5081_v44 }
 0x4b3   : > { %v2057_v20 = vmul.f32 0.5, %v1995_v55  ;;  %v1997_v63 = vmax.f32 %v5093_v52, 0.0  ;;  %v1999_v25 = vmax.f32 %v1919_v22, 0.0 }
 0x4b4   : > { %v3245_v36 = vpack.c.bf16 %v1994_v58, %v1993_v6  ;;  %v2058_v40 = vmul.f32 0.5, %v1996_v59  ;;  %v3261_v0 = vpack.c.bf16 %v1996_v59, %v1995_v55  ;;  %v1998_v7 = vmax.f32 %v5098_v60, 0.0  ;;  %v2153_v55 = vld [vmem:[%s4616_s20] sm:$0xff] }
 0x4b5   : > { %v2089_v5 = vmul.f32 1.442695, %v2057_v20  ;;  %v2059_v9 = vmul.f32 0.5, %v1999_v25  ;;  %v2000_v37 = vmax.f32 %v1921_v61, 0.0 }
 0x4b6   : > { %2393 = vst [vmem:[%s5108_s2] sm:$0xff] %v3245_v36  ;;  %v2091_v43 = vmul.f32 1.442695, %v2058_v40  ;;  %2505 = vst [vmem:[%s5112_s23] sm:$0xff] %v3261_v0  ;;  %v3246_v10 = vpack.c.bf16 %v1998_v7, %v1997_v63  ;;  %v1811_v62 = vpop.f32.mrb[36].mxu1  ;;  %v1924_v2 = vpop.f32.mrb[52].mxu0 }
 0x4b7   : > { %3689 = vpow2.f32 %v2089_v5  ;;  %v2093_v8 = vmul.f32 1.442695, %v2059_v9  ;;  %v2060_v11 = vmul.f32 0.5, %v2000_v37  ;;  %v3262_v57 = vpack.c.bf16 %v2000_v37, %v1999_v25  ;;  %v1813_v1 = vpop.f32.mrb[37].mxu1  ;;  %v1926_v33 = vpop.f32.mrb[53].mxu0  ;;  %v2154_v25 = vld [vmem:[%s4616_s20 + $0x8] sm:$0xff] }
 0x4b8   : > { %3691 = vpow2.f32 %v2091_v43  ;;  %2394 = vst [vmem:[%s5108_s2 + $0x8] sm:$0xff] %v3246_v10  ;;  %v5121_v48 = vadd.f32 %v1811_v62, %v5073_v39  ;;  %v1925_v12 = vadd.f32 %v1924_v2, %v5075_v41  ;;  %v5125_v13 = vadd.f32 %v1813_v1, %v5079_v42  ;;  %v1815_v54 = vpop.f32.mrb[38].mxu1  ;;  %v1928_v15 = vpop.f32.mrb[54].mxu0  ;;  %v2155_v43 = vld [vmem:[%s4616_s20 + $0x10] sm:$0xff] }
 0x4b9   : > { %3693 = vpow2.f32 %v2093_v8  ;;  %v2095_v17 = vmul.f32 1.442695, %v2060_v11  ;;  %2506 = vst [vmem:[%s5112_s23 + $0x8] sm:$0xff] %v3262_v57  ;;  %v1927_v18 = vadd.f32 %v1926_v33, %v5081_v44  ;;  %v5130_v19 = vadd.f32 %v1815_v54, %v5073_v39  ;;  %v1817_v23 = vpop.f32.mrb[39].mxu1  ;;  %v1930_v24 = vpop.f32.mrb[55].mxu0 }
 0x4ba   : > { %v2001_v27 = vmax.f32 %v5121_v48, 0.0  ;;  %v2003_v28 = vmax.f32 %v1925_v12, 0.0  ;;  %v2002_v29 = vmax.f32 %v5125_v13, 0.0  ;;  %v1929_v31 = vadd.f32 %v1928_v15, %v5075_v41 }
 0x4bb   : > { %3695 = vpow2.f32 %v2095_v17  ;;  %v2004_v32 = vmax.f32 %v1927_v18, 0.0  ;;  %v2005_v14 = vmax.f32 %v5130_v19, 0.0  ;;  %v5137_v26 = vadd.f32 %v1817_v23, %v5079_v42  ;;  %v2156_v17 = vld [vmem:[%s4616_s20 + $0x18] sm:$0xff] }
 0x4bc   : > { %v2061_v34 = vmul.f32 0.5, %v2003_v28  ;;  %v3247_v16 = vpack.c.bf16 %v2002_v29, %v2001_v27  ;;  %v2007_v35 = vmax.f32 %v1929_v31, 0.0  ;;  %v1931_v38 = vadd.f32 %v1930_v24, %v5081_v44 }
 0x4bd   : > { %v2062_v45 = vmul.f32 0.5, %v2004_v32  ;;  %v3263_v46 = vpack.c.bf16 %v2004_v32, %v2003_v28  ;;  %v2006_v47 = vmax.f32 %v5137_v26, 0.0 }
 0x4be   : > { %v2097_v49 = vmul.f32 1.442695, %v2061_v34  ;;  %2395 = vst [vmem:[%s5108_s2 + $0x10] sm:$0xff] %v3247_v16  ;;  %v2063_v50 = vmul.f32 0.5, %v2007_v35  ;;  %v2008_v30 = vmax.f32 %v1931_v38, 0.0  ;;  %v1821_v51 = vpop.f32.mrb[40].mxu1 }
 0x4bf   : > { %v1934_v3 = vpop.f32.mrb[56].mxu0  ;;  %v2099_v22 = vmul.f32 1.442695, %v2062_v45  ;;  %2507 = vst [vmem:[%s5112_s23 + $0x10] sm:$0xff] %v3263_v46  ;;  %v3248_v53 = vpack.c.bf16 %v2006_v47, %v2005_v14  ;;  %v5153_v56 = vadd.f32 %v1821_v51, %v5073_v39  ;;  %v1823_v61 = vpop.f32.mrb[41].mxu1 }
 0x4c0   : > { %v1935_v59 = vadd.f32 %v1934_v3, %v5075_v41  ;;  %v1936_v20 = vpop.f32.mrb[57].mxu0  ;;  %3697 = vpow2.f32 %v2097_v49  ;;  %v2101_v36 = vmul.f32 1.442695, %v2063_v50  ;;  %v2064_v40 = vmul.f32 0.5, %v2008_v30  ;;  %v1825_v5 = vpop.f32.mrb[42].mxu1 }
 0x4c1   : > { %v3264_v0 = vpack.c.bf16 %v2008_v30, %v2007_v35  ;;  %v1938_v9 = vpop.f32.mrb[58].mxu0  ;;  %v3690_v37 = vpop.eup %3689  ;;  %3699 = vpow2.f32 %v2099_v22  ;;  %2396 = vst [vmem:[%s5108_s2 + $0x18] sm:$0xff] %v3248_v53  ;;  %v2009_v10 = vmax.f32 %v5153_v56, 0.0  ;;  %v5161_v2 = vadd.f32 %v1823_v61, %v5079_v42 }
 0x4c2   : > { %v2011_v62 = vmax.f32 %v1935_v59, 0.0  ;;  %v1827_v8 = vpop.f32.mrb[43].mxu1  ;;  %v1940_v11 = vpop.f32.mrb[59].mxu0  ;;  %v2185_v1 = vmul.f32 %v3690_v37, %v2153_v55  ;;  %3701 = vpow2.f32 %v2101_v36  ;;  %v2103_v33 = vmul.f32 1.442695, %v2064_v40 }
 0x4c3   : > { %v3692_v57 = vpop.eup %3691  ;;  %2508 = vst [vmem:[%s5112_s23 + $0x18] sm:$0xff] %v3264_v0  ;;  %v1937_v12 = vadd.f32 %v1936_v20, %v5081_v44  ;;  %v2010_v23 = vmax.f32 %v5161_v2, 0.0  ;;  %v5168_v24 = vadd.f32 %v1825_v5, %v5073_v39  ;;  %v5184_v51 = vadd.f32 %v1827_v8, %v5079_v42 }
 0x4c4   : > { %v3694_v54 = vpop.eup %3693  ;;  %v2186_v15 = vmul.f32 %v3692_v57, %v2154_v25  ;;  %v2065_v18 = vmul.f32 0.5, %v2011_v62  ;;  %v2217_v28 = vadd.f32 %v2185_v1, %v1993_v6  ;;  %3703 = vpow2.f32 %v2103_v33  ;;  %v2158_v25 = vld [vmem:[%s4616_s20 + $0x28] sm:$0xff] }
 0x4c5   : > { %v2187_v31 = vmul.f32 %v3694_v54, %v2155_v43  ;;  %v2012_v32 = vmax.f32 %v1937_v12, 0.0  ;;  %v3696_v34 = vpop.eup %3695  ;;  %v3249_v38 = vpack.c.bf16 %v2010_v23, %v2009_v10  ;;  %v2013_v45 = vmax.f32 %v5168_v24, 0.0  ;;  %v2159_v43 = vld [vmem:[%s4616_s20 + $0x30] sm:$0xff] }
 0x4c6   : > { %v2218_v16 = vadd.f32 %v2186_v15, %v1994_v58  ;;  %v2105_v35 = vmul.f32 1.442695, %v2065_v18  ;;  %v2188_v6 = vmul.f32 %v3696_v34, %v2156_v17  ;;  %v1831_v50 = vpop.f32.mrb[44].mxu1  ;;  %v1944_v30 = vpop.f32.mrb[60].mxu0  ;;  %v1939_v58 = vadd.f32 %v1938_v9, %v5075_v41  ;;  %v2160_v17 = vld [vmem:[%s4616_s20 + $0x38] sm:$0xff] }
 0x4c7   : > { %v2219_v21 = vadd.f32 %v2187_v31, %v1997_v63  ;;  %v2066_v46 = vmul.f32 0.5, %v2012_v32  ;;  %v3265_v49 = vpack.c.bf16 %v2012_v32, %v2011_v62  ;;  %2397 = vst [vmem:[%s5108_s2 + $0x20] sm:$0xff] %v3249_v38  ;;  %v1833_v3 = vpop.f32.mrb[45].mxu1  ;;  %v1946_v55 = vpop.f32.mrb[61].mxu0  ;;  %v2157_v63 = vld [vmem:[%s4616_s20 + $0x20] sm:$0xff]  ;;  %v1941_v53 = vadd.f32 %v1940_v11, %v5081_v44 }
 0x4c8   : > { %v3277_v4 = vpack.c.bf16 %v2218_v16, %v2217_v28  ;;  %3705 = vpow2.f32 %v2105_v35  ;;  %v2220_v52 = vadd.f32 %v2188_v6, %v1998_v7  ;;  %v5192_v59 = vadd.f32 %v1831_v50, %v5073_v39  ;;  %v1835_v61 = vpop.f32.mrb[46].mxu1  ;;  %v1948_v20 = vpop.f32.mrb[62].mxu0 }
 0x4c9   : > { %v2107_v22 = vmul.f32 1.442695, %v2066_v46  ;;  %2509 = vst [vmem:[%s5112_s23 + $0x20] sm:$0xff] %v3265_v49  ;;  %v2015_v36 = vmax.f32 %v1939_v58, 0.0  ;;  %v2014_v60 = vmax.f32 %v5184_v51, 0.0  ;;  %v1945_v7 = vadd.f32 %v1944_v30, %v5075_v41  ;;  %v1837_v0 = vpop.f32.mrb[47].mxu1 }
 0x4ca   : > { %2617 = vst [vmem:[%s5195_s5] sm:$0xff] %v3277_v4  ;;  %v5202_v40 = vadd.f32 %v1833_v3, %v5079_v42  ;;  %v1950_v5 = vpop.f32.mrb[63].mxu0  ;;  %v3698_v9 = vpop.eup %3697  ;;  %v3278_v37 = vpack.c.bf16 %v2220_v52, %v2219_v21  ;;  %v2016_v62 = vmax.f32 %v1941_v53, 0.0  ;;  %v2017_v8 = vmax.f32 %v5192_v59, 0.0  ;;  %v2161_v4 = vld [vmem:[%s4616_s20 + $0x40] sm:$0xff] }
 0x4cb   : > { %3707 = vpow2.f32 %v2107_v22  ;;  %v3700_v11 = vpop.eup %3699  ;;  %v2189_v57 = vmul.f32 %v3698_v9, %v2157_v63  ;;  %v2067_v1 = vmul.f32 0.5, %v2015_v36  ;;  %v3250_v33 = vpack.c.bf16 %v2014_v60, %v2013_v45  ;;  %v2162_v9 = vld [vmem:[%s4616_s20 + $0x48] sm:$0xff] }
 0x4cc   : > { %v2019_v12 = vmax.f32 %v1945_v7, 0.0  ;;  %v3702_v54 = vpop.eup %3701  ;;  %2618 = vst [vmem:[%s5195_s5 + $0x8] sm:$0xff] %v3278_v37  ;;  %v2190_v15 = vmul.f32 %v3700_v11, %v2158_v25  ;;  %v2068_v18 = vmul.f32 0.5, %v2016_v62  ;;  %v3266_v28 = vpack.c.bf16 %v2016_v62, %v2015_v36 }
 0x4cd   : > { %v2018_v31 = vmax.f32 %v5202_v40, 0.0  ;;  %v2221_v32 = vadd.f32 %v2189_v57, %v2001_v27  ;;  %v2191_v34 = vmul.f32 %v3702_v54, %v2159_v43  ;;  %v2109_v16 = vmul.f32 1.442695, %v2067_v1  ;;  %2398 = vst [vmem:[%s5108_s2 + $0x28] sm:$0xff] %v3250_v33 }
 0x4ce   : > { %v2069_v35 = vmul.f32 0.5, %v2019_v12  ;;  %v3704_v38 = vpop.eup %3703  ;;  %v2222_v21 = vadd.f32 %v2190_v15, %v2002_v29  ;;  %v2111_v6 = vmul.f32 1.442695, %v2068_v18  ;;  %2510 = vst [vmem:[%s5112_s23 + $0x28] sm:$0xff] %v3266_v28  ;;  %v1947_v48 = vadd.f32 %v1946_v55, %v5081_v44  ;;  %v1841_v49 = vpop.f32.mrb[48].mxu1 }
 0x4cf   : > { %v3251_v46 = vpack.c.bf16 %v2018_v31, %v2017_v8  ;;  %v1954_v27 = vpop.f32.mrb[64].mxu0  ;;  %v2223_v50 = vadd.f32 %v2191_v34, %v2005_v14  ;;  %v2192_v30 = vmul.f32 %v3704_v38, %v2160_v17  ;;  %3709 = vpow2.f32 %v2109_v16  ;;  %v1843_v29 = vpop.f32.mrb[49].mxu1  ;;  %v2163_v16 = vld [vmem:[%s4616_s20 + $0x50] sm:$0xff] }
 0x4d0   : > { %v2113_v13 = vmul.f32 1.442695, %v2069_v35  ;;  %v1956_v58 = vpop.f32.mrb[65].mxu0  ;;  %v3279_v3 = vpack.c.bf16 %v2222_v21, %v2221_v32  ;;  %3711 = vpow2.f32 %v2111_v6  ;;  %v2020_v52 = vmax.f32 %v1947_v48, 0.0  ;;  %v1845_v55 = vpop.f32.mrb[50].mxu1  ;;  %v2164_v48 = vld [vmem:[%s4616_s20 + $0x58] sm:$0xff] }
 0x4d1   : > { %2399 = vst [vmem:[%s5108_s2 + $0x30] sm:$0xff] %v3251_v46  ;;  %v5229_v63 = vadd.f32 %v1835_v61, %v5073_v39  ;;  %v1958_v22 = vpop.f32.mrb[66].mxu0  ;;  %v2224_v19 = vadd.f32 %v2192_v30, %v2006_v47  ;;  %v1949_v14 = vadd.f32 %v1948_v20, %v5075_v41  ;;  %v5235_v25 = vadd.f32 %v1837_v0, %v5079_v42  ;;  %v5237_v36 = vpop.f32.mrb[51].mxu1 }
 0x4d2   : > { %v3706_v53 = vpop.eup %3705  ;;  %3713 = vpow2.f32 %v2113_v13  ;;  %v5239_v7 = vpop.f32.mrb[67].mxu0  ;;  %2619 = vst [vmem:[%s5195_s5 + $0x10] sm:$0xff] %v3279_v3  ;;  %v2070_v37 = vmul.f32 0.5, %v2020_v52  ;;  %v3267_v43 = vpack.c.bf16 %v2020_v52, %v2019_v12  ;;  %v1951_v0 = vadd.f32 %v1950_v5, %v5081_v44 }
 0x4d3   : > { %v2193_v61 = vmul.f32 %v3706_v53, %v2161_v4  ;;  %v2021_v26 = vmax.f32 %v5229_v63, 0.0  ;;  %v3280_v47 = vpack.c.bf16 %v2224_v19, %v2223_v50  ;;  %v2023_v62 = vmax.f32 %v1949_v14, 0.0 }
 0x4d4   : > { %v2022_v20 = vmax.f32 %v5235_v25, 0.0  ;;  %v2115_v1 = vmul.f32 1.442695, %v2070_v37  ;;  %2511 = vst [vmem:[%s5112_s23 + $0x30] sm:$0xff] %v3267_v43  ;;  %v5250_v33 = vadd.f32 %v1841_v49, %v5073_v39  ;;  %v1955_v12 = vadd.f32 %v1954_v27, %v5075_v41 }
 0x4d5   : > { %v3708_v11 = vpop.eup %3707  ;;  %v2225_v57 = vadd.f32 %v2193_v61, %v2009_v10  ;;  %2620 = vst [vmem:[%s5195_s5 + $0x18] sm:$0xff] %v3280_v47  ;;  %v2071_v15 = vmul.f32 0.5, %v2023_v62  ;;  %v2024_v56 = vmax.f32 %v1951_v0, 0.0  ;;  %v5260_v18 = vadd.f32 %v1843_v29, %v5079_v42  ;;  %v2165_v29 = vld [vmem:[%s4616_s20 + $0x60] sm:$0xff] }
 0x4d6   : > { %v2194_v54 = vmul.f32 %v3708_v11, %v2162_v9  ;;  %v3252_v5 = vpack.c.bf16 %v2022_v20, %v2021_v26  ;;  %3715 = vpow2.f32 %v2115_v1  ;;  %v2025_v10 = vmax.f32 %v5250_v33, 0.0  ;;  %v1851_v28 = vpop.f32.mrb[52].mxu1  ;;  %v1964_v32 = vpop.f32.mrb[68].mxu0 }
 0x4d7   : > { %v2027_v17 = vmax.f32 %v1955_v12, 0.0  ;;  %v2117_v35 = vmul.f32 1.442695, %v2071_v15  ;;  %v2072_v38 = vmul.f32 0.5, %v2024_v56  ;;  %v3268_v21 = vpack.c.bf16 %v2024_v56, %v2023_v62  ;;  %v1853_v6 = vpop.f32.mrb[53].mxu1  ;;  %v5266_v46 = vpop.f32.mrb[69].mxu0 }
 0x4d8   : > { %v2226_v34 = vadd.f32 %v2194_v54, %v2010_v23  ;;  %2400 = vst [vmem:[%s5108_s2 + $0x38] sm:$0xff] %v3252_v5  ;;  %v2026_v27 = vmax.f32 %v5260_v18, 0.0  ;;  %v1957_v50 = vadd.f32 %v1956_v58, %v5081_v44  ;;  %v5272_v30 = vadd.f32 %v1845_v55, %v5073_v39  ;;  %v5274_v2 = vpop.f32.mrb[54].mxu1  ;;  %v5276_v23 = vpop.f32.mrb[70].mxu0  ;;  %v2166_v5 = vld [vmem:[%s4616_s20 + $0x68] sm:$0xff] }
 0x4d9   : > { %v2073_v49 = vmul.f32 0.5, %v2027_v17  ;;  %v3710_v4 = vpop.eup %3709  ;;  %3717 = vpow2.f32 %v2117_v35  ;;  %v2119_v3 = vmul.f32 1.442695, %v2072_v38  ;;  %2512 = vst [vmem:[%s5112_s23 + $0x38] sm:$0xff] %v3268_v21  ;;  %v1959_v52 = vadd.f32 %v1958_v22, %v5075_v41  ;;  %v5281_v53 = vpop.f32.mrb[55].mxu1  ;;  %v2167_v21 = vld [vmem:[%s4616_s20 + $0x70] sm:$0xff] }
 0x4da   : > { %v3281_v13 = vpack.c.bf16 %v2226_v34, %v2225_v57  ;;  %v5283_v58 = vpop.f32.mrb[71].mxu0  ;;  %v3712_v55 = vpop.eup %3711  ;;  %v2195_v19 = vmul.f32 %v3710_v4, %v2163_v16  ;;  %v3253_v61 = vpack.c.bf16 %v2026_v27, %v2025_v10  ;;  %v2028_v9 = vmax.f32 %v1957_v50, 0.0 }
 0x4db   : > { %v2121_v14 = vmul.f32 1.442695, %v2073_v49  ;;  %v2196_v43 = vmul.f32 %v3712_v55, %v2164_v48  ;;  %3719 = vpow2.f32 %v2119_v3  ;;  %v2029_v22 = vmax.f32 %v5272_v30, 0.0 }
 0x4dc   : > { %v3714_v37 = vpop.eup %3713  ;;  %2621 = vst [vmem:[%s5195_s5 + $0x20] sm:$0xff] %v3281_v13  ;;  %v2031_v47 = vmax.f32 %v1959_v52, 0.0  ;;  %v2227_v62 = vadd.f32 %v2195_v19, %v2013_v45  ;;  %2401 = vst [vmem:[%s5108_s2 + $0x40] sm:$0xff] %v3253_v61  ;;  %v2074_v11 = vmul.f32 0.5, %v2028_v9  ;;  %v3269_v1 = vpack.c.bf16 %v2028_v9, %v2027_v17  ;;  %v2168_v52 = vld [vmem:[%s4616_s20 + $0x78] sm:$0xff]  ;;  %v2169_v9 = vld [vmem:[%s4616_s20 + $0x80] sm:$0xff] }
 0x4dd   : > { %v2197_v0 = vmul.f32 %v3714_v37, %v2165_v29  ;;  %3721 = vpow2.f32 %v2121_v14  ;;  %v2228_v57 = vadd.f32 %v2196_v43, %v2014_v60  ;;  %v5298_v54 = vadd.f32 %v5237_v36, %v5079_v42 }
 0x4de   : > { %v2075_v12 = vmul.f32 0.5, %v2031_v47  ;;  %v2123_v24 = vmul.f32 1.442695, %v2074_v11  ;;  %v1961_v45 = vadd.f32 %v5239_v7, %v5081_v44  ;;  %v5306_v56 = vadd.f32 %v1851_v28, %v5073_v39  ;;  %v5308_v51 = vpop.f32.mrb[56].mxu1  ;;  %2513 = vst [vmem:[%s5112_s23 + $0x40] sm:$0xff] %v3269_v1 }
 0x4df   : > { %v2229_v15 = vadd.f32 %v2197_v0, %v2017_v8  ;;  %v3282_v60 = vpack.c.bf16 %v2228_v57, %v2227_v62  ;;  %v2030_v36 = vmax.f32 %v5298_v54, 0.0  ;;  %v1965_v59 = vadd.f32 %v1964_v32, %v5075_v41  ;;  %v1863_v8 = vpop.f32.mrb[57].mxu1 }
 0x4e0   : > { %v2125_v17 = vmul.f32 1.442695, %v2075_v12  ;;  %v3716_v34 = vpop.eup %3715  ;;  %3723 = vpow2.f32 %v2123_v24  ;;  %v2032_v16 = vmax.f32 %v1961_v45, 0.0  ;;  %v2033_v35 = vmax.f32 %v5306_v56, 0.0  ;;  %v5317_v28 = vpop.f32.mrb[58].mxu1 }
 0x4e1   : > { %v5315_v7 = vadd.f32 %v1853_v6, %v5079_v42  ;;  %2622 = vst [vmem:[%s5195_s5 + $0x28] sm:$0xff] %v3282_v60  ;;  %v2198_v38 = vmul.f32 %v3716_v34, %v2166_v5  ;;  %v3254_v32 = vpack.c.bf16 %v2030_v36, %v2029_v22  ;;  %v2035_v48 = vmax.f32 %v1965_v59, 0.0  ;;  %v5325_v49 = vpop.f32.mrb[59].mxu1  ;;  %v2170_v60 = vld [vmem:[%s4616_s20 + $0x88] sm:$0xff] }
 0x4e2   : > { %3725 = vpow2.f32 %v2125_v17  ;;  %v2076_v50 = vmul.f32 0.5, %v2032_v16  ;;  %v3270_v6 = vpack.c.bf16 %v2032_v16, %v2031_v47  ;;  %v1967_v13 = vadd.f32 %v5266_v46, %v5081_v44  ;;  %v2171_v16 = vld [vmem:[%s4616_s20 + $0x90] sm:$0xff] }
 0x4e3   : > { %v2034_v4 = vmax.f32 %v5315_v7, 0.0  ;;  %v3718_v29 = vpop.eup %3717  ;;  %v2230_v3 = vadd.f32 %v2198_v38, %v2018_v31  ;;  %2402 = vst [vmem:[%s5108_s2 + $0x48] sm:$0xff] %v3254_v32  ;;  %v2077_v55 = vmul.f32 0.5, %v2035_v48  ;;  %v5336_v19 = vadd.f32 %v5274_v2, %v5073_v39 }
 0x4e4   : > { %v1969_v14 = vadd.f32 %v5276_v23, %v5075_v41  ;;  %v2199_v61 = vmul.f32 %v3718_v29, %v2167_v21  ;;  %v2127_v37 = vmul.f32 1.442695, %v2076_v50  ;;  %2514 = vst [vmem:[%s5112_s23 + $0x48] sm:$0xff] %v3270_v6  ;;  %v2036_v31 = vmax.f32 %v1967_v13, 0.0 }
 0x4e5   : > { %v3255_v40 = vpack.c.bf16 %v2034_v4, %v2033_v35  ;;  %v3720_v46 = vpop.eup %3719  ;;  %v3283_v43 = vpack.c.bf16 %v2230_v3, %v2229_v15  ;;  %v2129_v47 = vmul.f32 1.442695, %v2077_v55  ;;  %v2037_v2 = vmax.f32 %v5336_v19, 0.0 }
 0x4e6   : > { %v2039_v62 = vmax.f32 %v1969_v14, 0.0  ;;  %v2231_v0 = vadd.f32 %v2199_v61, %v2021_v26  ;;  %v2200_v11 = vmul.f32 %v3720_v46, %v2168_v52  ;;  %3727 = vpow2.f32 %v2127_v37  ;;  %v1871_v1 = vpop.f32.mrb[60].mxu1 }
 0x4e7   : > { %v3722_v23 = vpop.eup %3721  ;;  %2403 = vst [vmem:[%s5108_s2 + $0x50] sm:$0xff] %v3255_v40  ;;  %v2078_v57 = vmul.f32 0.5, %v2036_v31  ;;  %2623 = vst [vmem:[%s5195_s5 + $0x30] sm:$0xff] %v3283_v43  ;;  %3729 = vpow2.f32 %v2129_v47  ;;  %v3271_v15 = vpack.c.bf16 %v2036_v31, %v2035_v48  ;;  %v1873_v24 = vpop.f32.mrb[61].mxu1  ;;  %v5356_v63 = vadd.f32 %v5281_v53, %v5079_v42  ;;  %v2173_v31 = vld [vmem:[%s4616_s20 + $0xa0] sm:$0xff] }
 0x4e8   : > { %v2201_v12 = vmul.f32 %v3722_v23, %v2169_v9  ;;  %v2079_v5 = vmul.f32 0.5, %v2039_v62  ;;  %v2232_v45 = vadd.f32 %v2200_v11, %v2022_v20  ;;  %v1971_v26 = vadd.f32 %v5283_v58, %v5081_v44  ;;  %v1875_v59 = vpop.f32.mrb[62].mxu1  ;;  %v2172_v9 = vld [vmem:[%s4616_s20 + $0x98] sm:$0xff] }
 0x4e9   : > { %v2131_v17 = vmul.f32 1.442695, %v2078_v57  ;;  %2515 = vst [vmem:[%s5112_s23 + $0x50] sm:$0xff] %v3271_v15  ;;  %v5366_v25 = vadd.f32 %v5308_v51, %v5073_v39  ;;  %v5369_v20 = vadd.f32 %v1863_v8, %v5079_v42  ;;  %v1877_v53 = vpop.f32.mrb[63].mxu1  ;;  %v2038_v58 = vmax.f32 %v5356_v63, 0.0 }
 0x4ea   : > { %v2233_v34 = vadd.f32 %v2201_v12, %v2025_v10  ;;  %v2133_v38 = vmul.f32 1.442695, %v2079_v5  ;;  %v3724_v21 = vpop.eup %3723  ;;  %v3284_v32 = vpack.c.bf16 %v2232_v45, %v2231_v0  ;;  %v2040_v48 = vmax.f32 %v1971_v26, 0.0  ;;  %v2174_v5 = vld [vmem:[%s4616_s20 + $0xa8] sm:$0xff]  ;;  %v2175_v26 = vld [vmem:[%s4616_s20 + $0xb0] sm:$0xff] }
 0x4eb   : > { %3731 = vpow2.f32 %v2131_v17  ;;  %v2202_v10 = vmul.f32 %v3724_v21, %v2170_v60  ;;  %v2041_v50 = vmax.f32 %v5366_v25, 0.0  ;;  %v2042_v51 = vmax.f32 %v5369_v20, 0.0 }
 0x4ec   : > { %v3726_v33 = vpop.eup %3725  ;;  %3733 = vpow2.f32 %v2133_v38  ;;  %2624 = vst [vmem:[%s5195_s5 + $0x38] sm:$0xff] %v3284_v32  ;;  %v3256_v6 = vpack.c.bf16 %v2038_v58, %v2037_v2  ;;  %v2080_v13 = vmul.f32 0.5, %v2040_v48  ;;  %v3272_v29 = vpack.c.bf16 %v2040_v48, %v2039_v62 }
 0x4ed   : > { %v2203_v8 = vmul.f32 %v3726_v33, %v2171_v16  ;;  %v2234_v3 = vadd.f32 %v2202_v10, %v2026_v27  ;;  %v3257_v52 = vpack.c.bf16 %v2042_v51, %v2041_v50  ;;  %v5387_v55 = vadd.f32 %v5317_v28, %v5073_v39 }
 0x4ee   : > { %v5391_v14 = vadd.f32 %v5325_v49, %v5079_v42  ;;  %2404 = vst [vmem:[%s5108_s2 + $0x58] sm:$0xff] %v3256_v6  ;;  %v2135_v18 = vmul.f32 1.442695, %v2080_v13  ;;  %2516 = vst [vmem:[%s5112_s23 + $0x58] sm:$0xff] %v3272_v29  ;;  %v5399_v27 = vadd.f32 %v1871_v1, %v5073_v39  ;;  %v5402_v37 = vadd.f32 %v1873_v24, %v5079_v42  ;;  %v1974_v28 = vpop.f32.mrb[64].mxu1 }
 0x4ef   : > { %v2235_v61 = vadd.f32 %v2203_v8, %v2029_v22  ;;  %v3285_v40 = vpack.c.bf16 %v2234_v3, %v2233_v34  ;;  %2405 = vst [vmem:[%s5108_s2 + $0x60] sm:$0xff] %v3257_v52  ;;  %v2045_v49 = vmax.f32 %v5387_v55, 0.0  ;;  %v5409_v22 = vadd.f32 %v1875_v59, %v5073_v39  ;;  %v1976_v46 = vpop.f32.mrb[65].mxu1 }
 0x4f0   : > { %v2046_v30 = vmax.f32 %v5391_v14, 0.0  ;;  %v3728_v43 = vpop.eup %3727  ;;  %3735 = vpow2.f32 %v2135_v18  ;;  %v2049_v47 = vmax.f32 %v5399_v27, 0.0  ;;  %v2050_v62 = vmax.f32 %v5402_v37, 0.0  ;;  %v1978_v0 = vpop.f32.mrb[66].mxu1 }
 0x4f1   : > { %v5414_v23 = vadd.f32 %v1877_v53, %v5079_v42  ;;  %v3730_v11 = vpop.eup %3729  ;;  %2625 = vst [vmem:[%s5195_s5 + $0x40] sm:$0xff] %v3285_v40  ;;  %v2204_v57 = vmul.f32 %v3728_v43, %v2172_v9  ;;  %v2053_v1 = vmax.f32 %v5409_v22, 0.0  ;;  %v1975_v12 = vadd.f32 %v1974_v28, %v5075_v41  ;;  %v1980_v15 = vpop.f32.mrb[67].mxu1 }
 0x4f2   : > { %v3258_v39 = vpack.c.bf16 %v2046_v30, %v2045_v49  ;;  %v2205_v42 = vmul.f32 %v3730_v11, %v2173_v31  ;;  %v3259_v24 = vpack.c.bf16 %v2050_v62, %v2049_v47  ;;  %v1977_v60 = vadd.f32 %v1976_v46, %v5081_v44 }
 0x4f3   : > { %v2054_v45 = vmax.f32 %v5414_v23, 0.0  ;;  %v2236_v17 = vadd.f32 %v2204_v57, %v2030_v36  ;;  %v2043_v59 = vmax.f32 %v1975_v12, 0.0  ;;  %v1979_v34 = vadd.f32 %v1978_v0, %v5075_v41 }
 0x4f4   : > { %2406 = vst [vmem:[%s5108_s2 + $0x68] sm:$0xff] %v3258_v39  ;;  %v1981_v16 = vadd.f32 %v1980_v15, %v5081_v44  ;;  %v5439_v53 = vadd.f32 %v2205_v42, %v2033_v35  ;;  %2407 = vst [vmem:[%s5108_s2 + $0x70] sm:$0xff] %v3259_v24  ;;  %v2044_v36 = vmax.f32 %v1977_v60, 0.0 }
 0x4f5   : > { %v3732_v38 = vpop.eup %3731  ;;  %v3260_v54 = vpack.c.bf16 %v2054_v45, %v2053_v1  ;;  %v3286_v32 = vpack.c.bf16 %v2236_v17, %v2235_v61  ;;  %v2081_v35 = vmul.f32 0.5, %v2043_v59  ;;  %v2047_v48 = vmax.f32 %v1979_v34, 0.0 }
 0x4f6   : > { %v3734_v21 = vpop.eup %3733  ;;  %v2206_v56 = vmul.f32 %v3732_v38, %v2174_v5  ;;  %v2082_v10 = vmul.f32 0.5, %v2044_v36  ;;  %v3273_v8 = vpack.c.bf16 %v2044_v36, %v2043_v59  ;;  %v2048_v6 = vmax.f32 %v1981_v16, 0.0  ;;  %v1984_v13 = vpop.f32.mrb[68].mxu1 }
 0x4f7   : > { %v2207_v33 = vmul.f32 %v3734_v21, %v2175_v26  ;;  %2408 = vst [vmem:[%s5108_s2 + $0x78] sm:$0xff] %v3260_v54  ;;  %2626 = vst [vmem:[%s5195_s5 + $0x48] sm:$0xff] %v3286_v32  ;;  %v2137_v3 = vmul.f32 1.442695, %v2081_v35  ;;  %v2083_v52 = vmul.f32 0.5, %v2047_v48  ;;  %v1985_v61 = vadd.f32 %v1984_v13, %v5075_v41  ;;  %v1986_v9 = vpop.f32.mrb[69].mxu1 }
 0x4f8   : > { %v2238_v29 = vadd.f32 %v2206_v56, %v2034_v4 }
 0x4f9   : > { %4052 = shalt.err (!%p4049_p0)
}
 0x4fa   : > { %s4053_s16 = scalar_lea.hbm %s5450_s4, 2048  ;;  %s4057_s2 = scalar_lea.hbm %s5718_s3, 4096 }
 0x4fb   : > { %p4054_p13 = scmp.ne.s32.totalorder %s5450_s4, %s4053_s16  ;;  %p4058_p12 = scmp.lt.u32.totalorder %s5450_s4, %s5718_s3 }
 0x4fc   : > { %p4059_p8 = scmp.lt.u32.totalorder %s4057_s2, %s4053_s16  ;;  %p4061_p11 = scmp.lt.u32.totalorder %s4053_s16, %s5450_s4 }
 0x4fd   : > { %p4055_p7 = pnand %p4054_p13, %p5713_p1 }
 0x4fe   : > { %p4060_p10 = por %p4059_p8, %p4058_p12 }
 0x4ff   : > { %p4056_p9 = pneg %p4055_p7 }
 0x500   : > { %p4062_p2 = por %p4061_p11, %p4060_p10 }
 0x502   : > { %p4063_p6 = pnand %p4062_p2, %p4056_p9 }
 0x504   : > { %4066 = shalt.err (!%p4063_p6)
}
 0x505   : > { %3455 = dma.vmem_to_hbm [thread:$0]  (%p5713_p1), %s5452_s30, 2048, %s5450_s4, %s2649_s28, %s4202_s27, %s4202_s27, %s4203_s25   ;;  %v2239_v7 = vadd.f32 %v2207_v33, %v2037_v2  ;;  %v2139_v18 = vmul.f32 1.442695, %v2082_v10  ;;  %v2084_v28 = vmul.f32 0.5, %v2048_v6  ;;  %v3274_v40 = vpack.c.bf16 %v2048_v6, %v2047_v48  ;;  %v1988_v31 = vpop.f32.mrb[70].mxu1  ;;  %v3736_v57 = vpop.eup %3735 }
 0x506   : > { %v2176_v4 = vld [vmem:[%s4616_s20 + $0xb8] sm:$0xff]  ;;  %2517 = vst [vmem:[%s5112_s23 + $0x60] sm:$0xff] %v3273_v8  ;;  %v3287_v46 = vpack.c.bf16 %v2238_v29, %v5439_v53  ;;  %3737 = vpow2.f32 %v2137_v3  ;;  %v2141_v43 = vmul.f32 1.442695, %v2083_v52  ;;  %v2051_v0 = vmax.f32 %v1985_v61, 0.0  ;;  %v1990_v11 = vpop.f32.mrb[71].mxu1 }
 0x507   : > { %3739 = vpow2.f32 %v2139_v18  ;;  %v2143_v39 = vmul.f32 1.442695, %v2084_v28  ;;  %2518 = vst [vmem:[%s5112_s23 + $0x68] sm:$0xff] %v3274_v40  ;;  %v1987_v19 = vadd.f32 %v1986_v9, %v5081_v44  ;;  %v1989_v2 = vadd.f32 %v1988_v31, %v5075_v41  ;;  %s2738_s30 = sshll.u32 %s5112_s23, 4  ;;  %s5719_s18 = sld [smem:[#allocation49_spill]]  ;;  %v2177_v53 = vld [vmem:[%s4616_s20 + $0xc0] sm:$0xff]  ;;  %s5505_s30 = int_to_ptr.vmem [resolvable:$true] %s2738_s30 }
 0x508   : > { %2627 = vst [vmem:[%s5195_s5 + $0x50] sm:$0xff] %v3287_v46  ;;  %v2208_v12 = vmul.f32 %v3736_v57, %v2176_v4  ;;  %3741 = vpow2.f32 %v2141_v43  ;;  %v2085_v15 = vmul.f32 0.5, %v2051_v0  ;;  %v1991_v42 = vadd.f32 %v1990_v11, %v5081_v44  ;;  %v2178_v54 = vld [vmem:[%s4616_s20 + $0xc8] sm:$0xff]  ;;  %s4067_s12 = scalar_lea.vmem %s5505_s30, 2048  ;;  %s4207_s16 = smov [#allocation20]  }
 0x509   : > { %3743 = vpow2.f32 %v2143_v39  ;;  %v2052_v5 = vmax.f32 %v1987_v19, 0.0  ;;  %v2055_v24 = vmax.f32 %v1989_v2, 0.0  ;;  %p4068_p3 = scmp.ne.s32.totalorder %s5505_s30, %s4067_s12  ;;  %s4071_s17 = sshll.u32 %s4207_s16, 4  ;;  %s4072_s17 = int_to_ptr.vmem [resolvable:$false] %s4071_s17 }
 0x50a   : > { %v2240_v60 = vadd.f32 %v2208_v12, %v2038_v58  ;;  %v2145_v17 = vmul.f32 1.442695, %v2085_v15  ;;  %v2056_v41 = vmax.f32 %v1991_v42, 0.0  ;;  %s4073_s15 = scalar_lea.vmem %s4072_s17, 4096  ;;  %p4074_p0 = scmp.lt.s32.totalorder %s5505_s30, %s4072_s17 }
 0x50b   : > { %v2086_v26 = vmul.f32 0.5, %v2052_v5  ;;  %v3275_v59 = vpack.c.bf16 %v2052_v5, %v2051_v0  ;;  %v2087_v34 = vmul.f32 0.5, %v2055_v24  ;;  %p4069_p5 = pnand %p4068_p3, %p5713_p1  ;;  %p4075_p13 = scmp.lt.s32.totalorder %s4073_s15, %s4067_s12 }
 0x50c   : > { %v3288_v16 = vpack.c.bf16 %v2240_v60, %v2239_v7  ;;  %3745 = vpow2.f32 %v2145_v17  ;;  %v2088_v44 = vmul.f32 0.5, %v2056_v41  ;;  %v3276_v38 = vpack.c.bf16 %v2056_v41, %v2055_v24 }
 0x50d   : > { %s5503_s21 = scalar_lea.hbm %s5719_s18, %s4957_s7  ;;  %v2147_v63 = vmul.f32 1.442695, %v2086_v26  ;;  %2519 = vst [vmem:[%s5112_s23 + $0x70] sm:$0xff] %v3275_v59  ;;  %v2149_v58 = vmul.f32 1.442695, %v2087_v34  ;;  %p4070_p4 = pneg %p4069_p5 }
 0x50e   : > { %2628 = vst [vmem:[%s5195_s5 + $0x58] sm:$0xff] %v3288_v16  ;;  %v2151_v36 = vmul.f32 1.442695, %v2088_v44  ;;  %2520 = vst [vmem:[%s5112_s23 + $0x78] sm:$0xff] %v3276_v38  ;;  %p4076_p7 = por %p4075_p13, %p4074_p0 }
 0x50f   : > { %3747 = vpow2.f32 %v2147_v63 }
 0x510   : > { %p4077_p9 = pnand %p4076_p7, %p4070_p4 }
 0x512   : > { %4080 = shalt.err (!%p4077_p9)
}
 0x513   : > { %s4081_s23 = scalar_lea.hbm %s5503_s21, 2048  ;;  %s4085_s10 = scalar_lea.hbm %s5719_s18, 4096 }
 0x514   : > { %p4082_p12 = scmp.ne.s32.totalorder %s5503_s21, %s4081_s23  ;;  %p4086_p11 = scmp.lt.u32.totalorder %s5503_s21, %s5719_s18 }
 0x515   : > { %p4087_p2 = scmp.lt.u32.totalorder %s4085_s10, %s4081_s23  ;;  %p4089_p3 = scmp.lt.u32.totalorder %s4081_s23, %s5503_s21 }
 0x516   : > { %p4083_p8 = pnand %p4082_p12, %p5713_p1 }
 0x517   : > { %p4088_p6 = por %p4087_p2, %p4086_p11 }
 0x518   : > { %p4084_p10 = pneg %p4083_p8 }
 0x519   : > { %p4090_p5 = por %p4089_p3, %p4088_p6 }
 0x51b   : > { %p4091_p4 = pnand %p4090_p5, %p4084_p10 }
 0x51d   : > { %4094 = shalt.err (!%p4091_p4)
}
 0x51e   : > { %3456 = dma.vmem_to_hbm [thread:$0]  (%p5713_p1), %s5505_s30, 2048, %s5503_s21, %s2649_s28, %s4202_s27, %s4202_s27, %s4203_s25   ;;  %v3738_v21 = vpop.eup %3737  ;;  %3749 = vpow2.f32 %v2149_v58 }
 0x51f   : > { %v2179_v32 = vld [vmem:[%s4616_s20 + $0xd0] sm:$0xff]  ;;  %v3740_v56 = vpop.eup %3739  ;;  %v2209_v35 = vmul.f32 %v3738_v21, %v2177_v53  ;;  %v2180_v48 = vld [vmem:[%s4616_s20 + $0xd8] sm:$0xff]  ;;  %3751 = vpow2.f32 %v2151_v36  ;;  %v2181_v52 = vld [vmem:[%s4616_s20 + $0xe0] sm:$0xff]  ;;  %s2755_s29 = sshll.u32 %s5195_s5, 4  ;;  %s5720_s30 = sld [smem:[#allocation50_spill]]  ;;  %s5570_s29 = int_to_ptr.vmem [resolvable:$true] %s2755_s29 }
 0x520   : > { %v3742_v33 = vpop.eup %3741  ;;  %v2210_v10 = vmul.f32 %v3740_v56, %v2178_v54  ;;  %v2182_v25 = vld [vmem:[%s4616_s20 + $0xe8] sm:$0xff]  ;;  %v2183_v28 = vld [vmem:[%s4616_s20 + $0xf0] sm:$0xff]  ;;  %v2184_v40 = vld [vmem:[%s4616_s20 + $0xf8] sm:$0xff]  ;;  %s2659_s12 = scalar_lea.sflag [#allocation22], %s4592_s0  ;;  %s4095_s16 = scalar_lea.vmem %s5570_s29, 2048 }
 0x521   : > { %v3744_v8 = vpop.eup %3743  ;;  %v2241_v6 = vadd.f32 %v2209_v35, %v2041_v50  ;;  %v2211_v13 = vmul.f32 %v3742_v33, %v2179_v32  ;;  %p4096_p0 = scmp.ne.s32.totalorder %s5570_s29, %s4095_s16  ;;  %s4208_s17 = smov [#allocation21]  }
 0x522   : > { %v2242_v29 = vadd.f32 %v2210_v10, %v2042_v51  ;;  %v2212_v3 = vmul.f32 %v3744_v8, %v2180_v48  ;;  %v3746_v9 = vpop.eup %3745  ;;  %s4099_s15 = sshll.u32 %s4208_s17, 4  ;;  %s4100_s15 = int_to_ptr.vmem [resolvable:$false] %s4099_s15 }
 0x523   : > { %v2243_v61 = vadd.f32 %v2211_v13, %v2045_v49  ;;  %v2213_v18 = vmul.f32 %v3746_v9, %v2181_v52  ;;  %v3748_v20 = vpop.eup %3747  ;;  %p4097_p13 = pnand %p4096_p0, %p5713_p1  ;;  %s4101_s23 = scalar_lea.vmem %s4100_s15, 4096 }
 0x524   : > { %v3289_v7 = vpack.c.bf16 %v2242_v29, %v2241_v6  ;;  %v2244_v4 = vadd.f32 %v2212_v3, %v2046_v30  ;;  %v2214_v49 = vmul.f32 %v3748_v20, %v2182_v25  ;;  %p4102_p9 = scmp.lt.s32.totalorder %s5570_s29, %s4100_s15  ;;  %p4103_p12 = scmp.lt.s32.totalorder %s4101_s23, %s4095_s16 }
 0x525   : > { %v2245_v51 = vadd.f32 %v2213_v18, %v2049_v47  ;;  %s5568_s21 = scalar_lea.hbm %s5720_s30, %s4957_s7  ;;  %p4098_p7 = pneg %p4097_p13 }
 0x526   : > { %2629 = vst [vmem:[%s5195_s5 + $0x60] sm:$0xff] %v3289_v7  ;;  %v3290_v50 = vpack.c.bf16 %v2244_v4, %v2243_v61  ;;  %v2246_v31 = vadd.f32 %v2214_v49, %v2050_v62  ;;  %p4104_p8 = por %p4103_p12, %p4102_p9 }
 0x528   : > { %v3750_v55 = vpop.eup %3749  ;;  %2630 = vst [vmem:[%s5195_s5 + $0x68] sm:$0xff] %v3290_v50  ;;  %v3291_v27 = vpack.c.bf16 %v2246_v31, %v2245_v51  ;;  %p4105_p10 = pnand %p4104_p8, %p4098_p7 }
 0x529   : > { %v3752_v14 = vpop.eup %3751  ;;  %v2215_v30 = vmul.f32 %v3750_v55, %v2183_v28 }
 0x52a   : > { %v2216_v46 = vmul.f32 %v3752_v14, %v2184_v40  ;;  %2631 = vst [vmem:[%s5195_s5 + $0x70] sm:$0xff] %v3291_v27 }
 0x52b   : > { %v2247_v43 = vadd.f32 %v2215_v30, %v2053_v1 }
 0x52c   : > { %v2248_v47 = vadd.f32 %v2216_v46, %v2054_v45 }
 0x52e   : > { %v3292_v0 = vpack.c.bf16 %v2248_v47, %v2247_v43 }
 0x530   : > { %2632 = vst [vmem:[%s5195_s5 + $0x78] sm:$0xff] %v3292_v0 }
 0x531   : > { %4108 = shalt.err (!%p4105_p10)
}
 0x532   : > { %s4109_s7 = scalar_lea.hbm %s5568_s21, 2048  ;;  %s4113_s19 = scalar_lea.hbm %s5720_s30, 4096 }
 0x533   : > { %p4110_p11 = scmp.ne.s32.totalorder %s5568_s21, %s4109_s7  ;;  %p4114_p3 = scmp.lt.u32.totalorder %s5568_s21, %s5720_s30 }
 0x534   : > { %p4115_p5 = scmp.lt.u32.totalorder %s4113_s19, %s4109_s7  ;;  %p4117_p0 = scmp.lt.u32.totalorder %s4109_s7, %s5568_s21 }
 0x535   : > { %p4111_p2 = pnand %p4110_p11, %p5713_p1 }
 0x536   : > { %p4116_p4 = por %p4115_p5, %p4114_p3 }
 0x537   : > { %p4112_p6 = pneg %p4111_p2 }
 0x538   : > { %p4118_p13 = por %p4117_p0, %p4116_p4 }
 0x53a   : > { %p4119_p7 = pnand %p4118_p13, %p4112_p6 }
 0x53c   : > { %4122 = shalt.err (!%p4119_p7)
}
 0x53d   : > { %3457 = dma.vmem_to_hbm [thread:$0]  (%p5713_p1), %s5570_s29, 2048, %s5568_s21, %s2659_s12, %s4202_s27, %s4202_s27, %s4203_s25  }
 0x53e PF: > { %s5721_s13 = sld [smem:[#allocation31_spill]]  ;;  %s5722_s20 = sld [smem:[#allocation33_spill]] }
 0x53f   : > { %p5724_p12 = scmp.ge.s32.totalorder %s4185_s24, 2 }
 0x544   : > { %s2770_s28 = sand.u32 1, %s5721_s13   ;;  %p5723_p9 = scmp.ne.s32.totalorder %s5722_s20, 0 }
 0x545   : > { %s2771_s16 = scalar_lea.sflag [#allocation4], %s2770_s28 }
 0x546   : > { %p3488_p8 = pnand %p5724_p12, %p5723_p9 }
 0x548   : > { %4156 = dma.done.wait (!%p3488_p8), %s2771_s16, 2048  }
 0x549   : > { %4158 = vsyncadd (!%p3488_p8), %s2771_s16, 4294965248  ;;  %s5725_s11 = sadd.s32 4294967294, %s4185_s24  }
 0x54a   : > { %s2779_s17 = sand.u32 1, %s5725_s11  }
 0x54b   : > { %s2780_s15 = scalar_lea.sflag [#allocation16], %s2779_s17 }
 0x54c   : > { %4160 = dma.done.wait (!%p3488_p8), %s2780_s15, 4096  }
 0x54d   : > { %4162 = vsyncadd (!%p3488_p8), %s2780_s15, 4294963200  ;;  %s2798_s0 = scalar_lea.sflag [#allocation19], %s2779_s17 }
 0x54e   : > { %4164 = dma.done.wait (!%p3488_p8), %s2798_s0, 4096  }
 0x54f   : > { %4166 = vsyncadd (!%p3488_p8), %s2798_s0, 4294963200  ;;  %s2816_s27 = scalar_lea.sflag [#allocation22], %s2770_s28 }
 0x550   : > { %4168 = dma.done.wait (!%p3488_p8), %s2816_s27, 2048  }
 0x551   : > { %4170 = vsyncadd (!%p3488_p8), %s2816_s27, 4294965248  ;;  %s5726_s24 = sld [smem:[#allocation34_spill]]  ;;  %s5727_s25 = sld [smem:[#allocation32_spill]] }
 0x552   : > { %s5728_s23 = sld [smem:[#allocation36_spill]]  ;;  %s5729_s21 = smov %s4177_s22 }
 0x557   : > { %p44_p1 = scmp.ge.s32.totalorder %s5726_s24, 4   ;;  %s5730_s22 = smov %s5727_s25 }
 0x559   :  { %46 = sbr.rel (!%p44_p1) target bundleno = 30 (0x1e), region = 230 }
 0x560   :  { %2821 = vsyncpa [#allocation3], 1 }
 0x561   :  { %2823 = vsyncpa [#allocation3 + $0x1], 1 }
 0x562   :  { %2824 = vsyncpa [#allocation6], 1 }
 0x563   :  { %2826 = vsyncpa [#allocation6 + $0x1], 1 }
 0x564   :  { %2827 = vsyncpa [#allocation9], 1 }
 0x565   :  { %2828 = vsyncpa [#allocation12], 1 }
 0x566   :  { %2829 = vsyncpa [#allocation4], 1 }
 0x567   :  { %2831 = vsyncpa [#allocation4 + $0x1], 1 }
 0x568   :  { %2832 = vsyncpa [#allocation16], 1 }
 0x569   :  { %2834 = vsyncpa [#allocation16 + $0x1], 1 }
 0x56a   :  { %2835 = vsyncpa [#allocation19], 1 }
 0x56b   :  { %2837 = vsyncpa [#allocation19 + $0x1], 1 }
 0x56c   :  { %2838 = vsyncpa [#allocation22], 1 }
 0x56d   :  { %2840 = vsyncpa [#allocation22 + $0x1], 1 }

</bundles_post_ra>
